<compile_context>
chip_gen: v7x
topology: tpu7x:2x2x1
jax: 0.10.0
libtpu: 0.0.40
codegen_flags: <defaults>
</compile_context>

<pallas_src>
import functools
import math

import jax
import jax.numpy as jnp
from jax.experimental import pallas as pl
from jax.experimental.pallas import tpu as pltpu

BN_EPS = 1e-5
_BF16_MIN_CH = 256           # use bf16 MXU inputs only for wide layers
_VMEM_FLOOR = 32 << 20       # never below the v6e/v7x default scoped limit
_VMEM_CAP = 48 << 20         # leave headroom on v7x's 64 MiB physical VMEM


def _pick_tile_n(n):
    """Largest lane tile from a preferred list that divides N (else full N)."""
    for tn in (1024, 512, 256, 128):
        if n % tn == 0:
            return tn
    return n  # full-dim block is exempt from the 128-divisibility rule


def _vmem_limit_bytes(blocks):
    """blocks: iterable of (shape, dtype). Double-buffering + 50% headroom."""
    total = 0
    for shape, dtype in blocks:
        total += math.prod(shape) * jnp.dtype(dtype).itemsize
    limit = int(total * 2 * 1.5) + (4 << 20)
    return max(_VMEM_FLOOR, min(limit, _VMEM_CAP))


# --------------------------------------------------------------------------
# Pass A: matmul + per-channel sum / sum-of-squares accumulation.
# --------------------------------------------------------------------------
def _stats_kernel(x_ref, w_ref, stats_ref, *, use_bf16):
    """x_ref: (1, C_in, TN); w_ref: (C_out, C_in); stats_ref: (2, C_out, 1)."""
    @pl.when(jnp.logical_and(pl.program_id(0) == 0, pl.program_id(1) == 0))
    def _init():
        stats_ref[...] = jnp.zeros_like(stats_ref)

    x = x_ref[0]          # (C_in, TN)
    w = w_ref[...]        # (C_out, C_in)
    if use_bf16:
        x = x.astype(jnp.bfloat16)
        w = w.astype(jnp.bfloat16)
    y = jnp.dot(w, x, preferred_element_type=jnp.float32)   # (C_out, TN)

    stats_ref[0] = stats_ref[0] + jnp.sum(y, axis=-1, keepdims=True)
    stats_ref[1] = stats_ref[1] + jnp.sum(y * y, axis=-1, keepdims=True)


# --------------------------------------------------------------------------
# Pass B: matmul + folded BN scale/shift + ReLU.
# --------------------------------------------------------------------------
def _norm_kernel(x_ref, w_ref, st_ref, o_ref, *, use_bf16):
    """x_ref: (1, C_in, TN); w_ref: (C_out, C_in); st_ref: (2, C_out, 1);
    o_ref: (1, C_out, TN)."""
    x = x_ref[0]
    w = w_ref[...]
    if use_bf16:
        x = x.astype(jnp.bfloat16)
        w = w.astype(jnp.bfloat16)
    y = jnp.dot(w, x, preferred_element_type=jnp.float32)   # (C_out, TN)

    s = st_ref[0]   # (C_out, 1)  gamma * rsqrt(var + eps)
    t = st_ref[1]   # (C_out, 1)  beta - mean * s
    o_ref[0] = jnp.maximum(y * s + t, 0.0).astype(o_ref.dtype)


# --------------------------------------------------------------------------
# One [Conv1d(k=1) -> BN(train) -> ReLU] layer.
# --------------------------------------------------------------------------
def _mlp_layer(x, w, gamma, beta, *, tn):
    b, c_in, n = x.shape
    c_out = w.shape[0]
    n_tiles = n // tn
    grid = (b, n_tiles)
    use_bf16 = (c_in >= _BF16_MIN_CH) and (c_out >= _BF16_MIN_CH)

    x_spec = pl.BlockSpec((1, c_in, tn), lambda i, j: (i, 0, j))
    w_spec = pl.BlockSpec((c_out, c_in), lambda i, j: (0, 0))
    st_spec = pl.BlockSpec((2, c_out, 1), lambda i, j: (0, 0, 0))

    common_blocks = [
        ((1, c_in, tn), x.dtype),        # input tile
        ((c_out, c_in), w.dtype),        # weights
        ((c_out, tn), jnp.float32),      # in-kernel f32 matmul result
    ]

    # ---- pass A: per-channel sum / sumsq over all B*N points ----
    stats = pl.pallas_call(
        functools.partial(_stats_kernel, use_bf16=use_bf16),
        out_shape=jax.ShapeDtypeStruct((2, c_out, 1), jnp.float32),
        grid_spec=pltpu.PrefetchScalarGridSpec(
            num_scalar_prefetch=0,
            grid=grid,
            in_specs=[x_spec, w_spec],
            out_specs=pl.BlockSpec((2, c_out, 1), lambda i, j: (0, 0, 0)),
        ),
        compiler_params=pltpu.CompilerParams(
            dimension_semantics=("arbitrary", "arbitrary"),
            vmem_limit_bytes=_vmem_limit_bytes(
                common_blocks + [((2, c_out, 1), jnp.float32)]),
        ),
    )(x, w)

    # ---- fold BN + affine into per-channel scale/shift (tiny, plain JAX) ----
    m_total = float(b * n)
    mean = stats[0, :, 0] / m_total
    ex2 = stats[1, :, 0] / m_total
    var = jnp.maximum(ex2 - mean * mean, 0.0)
    s = gamma * jax.lax.rsqrt(var + BN_EPS)
    t = beta - mean * s
    st = jnp.stack([s, t], axis=0)[:, :, None]   # (2, C_out, 1)

    # ---- pass B: normalize + ReLU, lane-dense output tiles ----
    out = pl.pallas_call(
        functools.partial(_norm_kernel, use_bf16=use_bf16),
        out_shape=jax.ShapeDtypeStruct((b, c_out, n), jnp.float32),
        grid_spec=pltpu.PrefetchScalarGridSpec(
            num_scalar_prefetch=0,
            grid=grid,
            in_specs=[x_spec, w_spec, st_spec],
            out_specs=pl.BlockSpec((1, c_out, tn), lambda i, j: (i, 0, j)),
        ),
        compiler_params=pltpu.CompilerParams(
            dimension_semantics=("parallel", "parallel"),
            vmem_limit_bytes=_vmem_limit_bytes(
                common_blocks + [((2, c_out, 1), jnp.float32),
                                 ((1, c_out, tn), jnp.float32)]),
        ),
    )(x, w, st)
    return out


# --------------------------------------------------------------------------
# Parameters / forward
# --------------------------------------------------------------------------
def init_mlpnet_params(key, nch_input, nch_layers):
    """Deterministic synthetic parameters matching MLPNet's shapes."""
    params = []
    last = nch_input
    for outp in nch_layers:
        key, kw, kb, kg, kbeta = jax.random.split(key, 5)
        w = jax.random.normal(kw, (outp, last), jnp.float32) * 0.1   # Conv1d weight
        b = jax.random.normal(kb, (outp,), jnp.float32) * 0.01       # Conv1d bias
        gamma = 1.0 + 0.05 * jax.random.normal(kg, (outp,), jnp.float32)
        beta = 0.05 * jax.random.normal(kbeta, (outp,), jnp.float32)
        params.append((w, b, gamma, beta))
        last = outp
    return params


@jax.jit
def mlpnet_forward(inp, params):
    """inp: (B, C_in, N) NCW like the torch module.  Returns (B, C_out, N)."""
    _, _, n = inp.shape
    tn = _pick_tile_n(n)
    x = inp.astype(jnp.float32)
    # Conv bias is intentionally unused: training-mode BN cancels it exactly.
    for (w, _bias, gamma, beta) in params:
        x = _mlp_layer(x, w, gamma, beta, tn=tn)
    return x


def _reference_forward(inp, params):
    """Pure-JAX reference with torch semantics (keeps the conv bias)."""
    x = inp.astype(jnp.float32)
    for (w, bias, gamma, beta) in params:
        y = jnp.einsum("oc,bcn->bon", w, x) + bias[None, :, None]
        mean = jnp.mean(y, axis=(0, 2), keepdims=True)
        var = jnp.mean((y - mean) ** 2, axis=(0, 2), keepdims=True)
        xhat = (y - mean) * jax.lax.rsqrt(var + BN_EPS)
        x = jnp.maximum(gamma[None, :, None] * xhat + beta[None, :, None], 0.0)
    return x


if __name__ == "__main__":
    key = jax.random.PRNGKey(0)
    k_inp, k_par = jax.random.split(key)

    # Small shapes: batch=2, nch_input=8, points=256, layers [32, 64].
    B, C_IN, N = 2, 8, 256
    NCH_LAYERS = [32, 64]

    inp = jax.random.normal(k_inp, (B, C_IN, N), jnp.float32)
    params = init_mlpnet_params(k_par, C_IN, NCH_LAYERS)

    out = jax.block_until_ready(mlpnet_forward(inp, params))
    ref = _reference_forward(inp, params)

    assert out.shape == (B, NCH_LAYERS[-1], N), out.shape
    max_err = float(jnp.max(jnp.abs(out - ref)))
    assert jnp.allclose(out, ref, atol=2e-4, rtol=2e-4), max_err

    print("KERNEL_OK")
</pallas_src>

<mosaic_0001>
module attributes {stable_mosaic.version = 11 : i64} {
  func.func @_stats_kernel(%arg0: i32, %arg1: i32, %arg2: memref<1x8x256xf32, #tpu.memory_space<vmem>>, %arg3: memref<32x8xf32, #tpu.memory_space<vmem>>, %arg4: memref<2x32x1xf32, #tpu.memory_space<vmem>>) attributes {dimension_semantics = [#tpu.dimension_semantics<arbitrary>, #tpu.dimension_semantics<arbitrary>], iteration_bounds = array<i64: 2, 1>, scalar_prefetch = 0 : i64, scratch_operands = 0 : i64, tpu.core_type = #tpu.core_type<tc>, window_params = [{transform_indices = @transform_0, window_bounds = array<i64: 1, 8, 256>}, {pipeline_mode = #tpu.pipeline_mode<synchronous>, transform_indices = @transform_1, window_bounds = array<i64: 32, 8>}, {pipeline_mode = #tpu.pipeline_mode<synchronous>, transform_indices = @transform_2, window_bounds = array<i64: 2, 32, 1>}]} {
    %c0_i32 = arith.constant 0 : i32
    %0 = arith.cmpi eq, %arg0, %c0_i32 : i32
    %c0_i32_0 = arith.constant 0 : i32
    %1 = arith.cmpi eq, %arg1, %c0_i32_0 : i32
    %2 = arith.andi %0, %1 : i1
    %3 = arith.extui %2 : i1 to i32
    %c0_i32_1 = arith.constant 0 : i32
    %4 = arith.cmpi ne, %3, %c0_i32_1 : i32
    scf.if %4 {
      %cst_19 = arith.constant 0.000000e+00 : f32
      %26 = vector.broadcast %cst_19 : f32 to vector<2x32x1xf32>
      %c0_20 = arith.constant 0 : index
      %c0_21 = arith.constant 0 : index
      %c0_22 = arith.constant 0 : index
      %27 = vector.load %arg4[%c0_20, %c0_21, %c0_22] : memref<2x32x1xf32, #tpu.memory_space<vmem>>, vector<2x32x1xf32>
      tpu.vector_store %arg4[%c0_20, %c0_21, %c0_22], %26 {strides = array<i32>} : memref<2x32x1xf32, #tpu.memory_space<vmem>>, vector<2x32x1xf32>,
    } else {
    }
    %c0 = arith.constant 0 : index
    %c0_2 = arith.constant 0 : index
    %c0_3 = arith.constant 0 : index
    %5 = vector.load %arg2[%c0, %c0_2, %c0_3] : memref<1x8x256xf32, #tpu.memory_space<vmem>>, vector<1x8x256xf32>
    %6 = vector.shape_cast %5 : vector<1x8x256xf32> to vector<8x256xf32>
    %c0_4 = arith.constant 0 : index
    %c0_5 = arith.constant 0 : index
    %7 = vector.load %arg3[%c0_4, %c0_5] : memref<32x8xf32, #tpu.memory_space<vmem>>, vector<32x8xf32>
    %cst = arith.constant dense<0.000000e+00> : vector<32x256xf32>
    %8 = tpu.matmul %7, %6, %cst {dimension_numbers = #tpu.dot_dimension_numbers<[1], [0], [0], [1], [0, 0, 1, 1], [], []>} : vector<32x8xf32>, vector<8x256xf32>, vector<32x256xf32> -> vector<32x256xf32>
    %c0_6 = arith.constant 0 : index
    %c0_7 = arith.constant 0 : index
    %c0_8 = arith.constant 0 : index
    %9 = vector.load %arg4[%c0_6, %c0_7, %c0_8] : memref<2x32x1xf32, #tpu.memory_space<vmem>>, vector<1x32x1xf32>
    %10 = vector.shape_cast %9 : vector<1x32x1xf32> to vector<32x1xf32>
    %cst_9 = arith.constant dense<0.000000e+00> : vector<32xf32>
    %11 = vector.multi_reduction <add>, %8, %cst_9 [1] : vector<32x256xf32> to vector<32xf32>
    %12 = vector.shape_cast %11 : vector<32xf32> to vector<32x1xf32>
    %13 = arith.addf %10, %12 : vector<32x1xf32>
    %c0_10 = arith.constant 0 : index
    %c0_11 = arith.constant 0 : index
    %c0_12 = arith.constant 0 : index
    %14 = vector.load %arg4[%c0_10, %c0_11, %c0_12] : memref<2x32x1xf32, #tpu.memory_space<vmem>>, vector<1x32x1xf32>
    %15 = vector.shape_cast %14 : vector<1x32x1xf32> to vector<32x1xf32>
    %16 = vector.shape_cast %13 : vector<32x1xf32> to vector<1x32x1xf32>
    tpu.vector_store %arg4[%c0_10, %c0_11, %c0_12], %16 {strides = array<i32>} : memref<2x32x1xf32, #tpu.memory_space<vmem>>, vector<1x32x1xf32>,
    %c1 = arith.constant 1 : index
    %c0_13 = arith.constant 0 : index
    %c0_14 = arith.constant 0 : index
    %17 = vector.load %arg4[%c1, %c0_13, %c0_14] : memref<2x32x1xf32, #tpu.memory_space<vmem>>, vector<1x32x1xf32>
    %18 = vector.shape_cast %17 : vector<1x32x1xf32> to vector<32x1xf32>
    %19 = arith.mulf %8, %8 : vector<32x256xf32>
    %cst_15 = arith.constant dense<0.000000e+00> : vector<32xf32>
    %20 = vector.multi_reduction <add>, %19, %cst_15 [1] : vector<32x256xf32> to vector<32xf32>
    %21 = vector.shape_cast %20 : vector<32xf32> to vector<32x1xf32>
    %22 = arith.addf %18, %21 : vector<32x1xf32>
    %c1_16 = arith.constant 1 : index
    %c0_17 = arith.constant 0 : index
    %c0_18 = arith.constant 0 : index
    %23 = vector.load %arg4[%c1_16, %c0_17, %c0_18] : memref<2x32x1xf32, #tpu.memory_space<vmem>>, vector<1x32x1xf32>
    %24 = vector.shape_cast %23 : vector<1x32x1xf32> to vector<32x1xf32>
    %25 = vector.shape_cast %22 : vector<32x1xf32> to vector<1x32x1xf32>
    tpu.vector_store %arg4[%c1_16, %c0_17, %c0_18], %25 {strides = array<i32>} : memref<2x32x1xf32, #tpu.memory_space<vmem>>, vector<1x32x1xf32>,
    return
  }
  func.func @transform_0(%arg0: i32, %arg1: i32) -> (i32, i32, i32) {
    %c0_i32 = arith.constant 0 : i32
    %c0_i32_0 = arith.constant 0 : i32
    return %arg0, %c0_i32, %arg1 : i32, i32, i32
  }
  func.func @transform_1(%arg0: i32, %arg1: i32) -> (i32, i32) {
    %c0_i32 = arith.constant 0 : i32
    %c0_i32_0 = arith.constant 0 : i32
    %c0_i32_1 = arith.constant 0 : i32
    return %c0_i32, %c0_i32_0 : i32, i32
  }
  func.func @transform_2(%arg0: i32, %arg1: i32) -> (i32, i32, i32) {
    %c0_i32 = arith.constant 0 : i32
    %c0_i32_0 = arith.constant 0 : i32
    %c0_i32_1 = arith.constant 0 : i32
    %c0_i32_2 = arith.constant 0 : i32
    return %c0_i32, %c0_i32_0, %c0_i32_1 : i32, i32, i32
  }
}

module attributes {stable_mosaic.version = 11 : i64} {
  func.func @_norm_kernel(%arg0: i32, %arg1: i32, %arg2: memref<1x8x256xf32, #tpu.memory_space<vmem>>, %arg3: memref<32x8xf32, #tpu.memory_space<vmem>>, %arg4: memref<2x32x1xf32, #tpu.memory_space<vmem>>, %arg5: memref<1x32x256xf32, #tpu.memory_space<vmem>>) attributes {dimension_semantics = [#tpu.dimension_semantics<parallel>, #tpu.dimension_semantics<parallel>], iteration_bounds = array<i64: 2, 1>, scalar_prefetch = 0 : i64, scratch_operands = 0 : i64, tpu.core_type = #tpu.core_type<tc>, window_params = [{transform_indices = @transform_0, window_bounds = array<i64: 1, 8, 256>}, {pipeline_mode = #tpu.pipeline_mode<synchronous>, transform_indices = @transform_1, window_bounds = array<i64: 32, 8>}, {pipeline_mode = #tpu.pipeline_mode<synchronous>, transform_indices = @transform_2, window_bounds = array<i64: 2, 32, 1>}, {transform_indices = @transform_3, window_bounds = array<i64: 1, 32, 256>}]} {
    %c0 = arith.constant 0 : index
    %c0_0 = arith.constant 0 : index
    %c0_1 = arith.constant 0 : index
    %0 = vector.load %arg2[%c0, %c0_0, %c0_1] : memref<1x8x256xf32, #tpu.memory_space<vmem>>, vector<1x8x256xf32>
    %1 = vector.shape_cast %0 : vector<1x8x256xf32> to vector<8x256xf32>
    %c0_2 = arith.constant 0 : index
    %c0_3 = arith.constant 0 : index
    %2 = vector.load %arg3[%c0_2, %c0_3] : memref<32x8xf32, #tpu.memory_space<vmem>>, vector<32x8xf32>
    %cst = arith.constant dense<0.000000e+00> : vector<32x256xf32>
    %3 = tpu.matmul %2, %1, %cst {dimension_numbers = #tpu.dot_dimension_numbers<[1], [0], [0], [1], [0, 0, 1, 1], [], []>} : vector<32x8xf32>, vector<8x256xf32>, vector<32x256xf32> -> vector<32x256xf32>
    %c0_4 = arith.constant 0 : index
    %c0_5 = arith.constant 0 : index
    %c0_6 = arith.constant 0 : index
    %4 = vector.load %arg4[%c0_4, %c0_5, %c0_6] : memref<2x32x1xf32, #tpu.memory_space<vmem>>, vector<1x32x1xf32>
    %5 = vector.shape_cast %4 : vector<1x32x1xf32> to vector<32x1xf32>
    %c1 = arith.constant 1 : index
    %c0_7 = arith.constant 0 : index
    %c0_8 = arith.constant 0 : index
    %6 = vector.load %arg4[%c1, %c0_7, %c0_8] : memref<2x32x1xf32, #tpu.memory_space<vmem>>, vector<1x32x1xf32>
    %7 = vector.shape_cast %6 : vector<1x32x1xf32> to vector<32x1xf32>
    %8 = vector.broadcast %5 : vector<32x1xf32> to vector<32x256xf32>
    %9 = arith.mulf %3, %8 : vector<32x256xf32>
    %10 = vector.broadcast %7 : vector<32x1xf32> to vector<32x256xf32>
    %11 = arith.addf %9, %10 : vector<32x256xf32>
    %cst_9 = arith.constant 0.000000e+00 : f32
    %12 = vector.broadcast %cst_9 : f32 to vector<32x256xf32>
    %13 = arith.maximumf %11, %12 : vector<32x256xf32>
    %c0_10 = arith.constant 0 : index
    %c0_11 = arith.constant 0 : index
    %c0_12 = arith.constant 0 : index
    %14 = vector.load %arg5[%c0_10, %c0_11, %c0_12] : memref<1x32x256xf32, #tpu.memory_space<vmem>>, vector<1x32x256xf32>
    %15 = vector.shape_cast %14 : vector<1x32x256xf32> to vector<32x256xf32>
    %16 = vector.shape_cast %13 : vector<32x256xf32> to vector<1x32x256xf32>
    tpu.vector_store %arg5[%c0_10, %c0_11, %c0_12], %16 {strides = array<i32>} : memref<1x32x256xf32, #tpu.memory_space<vmem>>, vector<1x32x256xf32>,
    return
  }
  func.func @transform_0(%arg0: i32, %arg1: i32) -> (i32, i32, i32) {
    %c0_i32 = arith.constant 0 : i32
    %c0_i32_0 = arith.constant 0 : i32
    return %arg0, %c0_i32, %arg1 : i32, i32, i32
  }
  func.func @transform_1(%arg0: i32, %arg1: i32) -> (i32, i32) {
    %c0_i32 = arith.constant 0 : i32
    %c0_i32_0 = arith.constant 0 : i32
    %c0_i32_1 = arith.constant 0 : i32
    return %c0_i32, %c0_i32_0 : i32, i32
  }
  func.func @transform_2(%arg0: i32, %arg1: i32) -> (i32, i32, i32) {
    %c0_i32 = arith.constant 0 : i32
    %c0_i32_0 = arith.constant 0 : i32
    %c0_i32_1 = arith.constant 0 : i32
    %c0_i32_2 = arith.constant 0 : i32
    return %c0_i32, %c0_i32_0, %c0_i32_1 : i32, i32, i32
  }
  func.func @transform_3(%arg0: i32, %arg1: i32) -> (i32, i32, i32) {
    %c0_i32 = arith.constant 0 : i32
    %c0_i32_0 = arith.constant 0 : i32
    return %arg0, %c0_i32, %arg1 : i32, i32, i32
  }
}

module attributes {stable_mosaic.version = 11 : i64} {
  func.func @_stats_kernel(%arg0: i32, %arg1: i32, %arg2: memref<1x32x256xf32, #tpu.memory_space<vmem>>, %arg3: memref<64x32xf32, #tpu.memory_space<vmem>>, %arg4: memref<2x64x1xf32, #tpu.memory_space<vmem>>) attributes {dimension_semantics = [#tpu.dimension_semantics<arbitrary>, #tpu.dimension_semantics<arbitrary>], iteration_bounds = array<i64: 2, 1>, scalar_prefetch = 0 : i64, scratch_operands = 0 : i64, tpu.core_type = #tpu.core_type<tc>, window_params = [{transform_indices = @transform_0, window_bounds = array<i64: 1, 32, 256>}, {pipeline_mode = #tpu.pipeline_mode<synchronous>, transform_indices = @transform_1, window_bounds = array<i64: 64, 32>}, {pipeline_mode = #tpu.pipeline_mode<synchronous>, transform_indices = @transform_2, window_bounds = array<i64: 2, 64, 1>}]} {
    %c0_i32 = arith.constant 0 : i32
    %0 = arith.cmpi eq, %arg0, %c0_i32 : i32
    %c0_i32_0 = arith.constant 0 : i32
    %1 = arith.cmpi eq, %arg1, %c0_i32_0 : i32
    %2 = arith.andi %0, %1 : i1
    %3 = arith.extui %2 : i1 to i32
    %c0_i32_1 = arith.constant 0 : i32
    %4 = arith.cmpi ne, %3, %c0_i32_1 : i32
    scf.if %4 {
      %cst_19 = arith.constant 0.000000e+00 : f32
      %26 = vector.broadcast %cst_19 : f32 to vector<2x64x1xf32>
      %c0_20 = arith.constant 0 : index
      %c0_21 = arith.constant 0 : index
      %c0_22 = arith.constant 0 : index
      %27 = vector.load %arg4[%c0_20, %c0_21, %c0_22] : memref<2x64x1xf32, #tpu.memory_space<vmem>>, vector<2x64x1xf32>
      tpu.vector_store %arg4[%c0_20, %c0_21, %c0_22], %26 {strides = array<i32>} : memref<2x64x1xf32, #tpu.memory_space<vmem>>, vector<2x64x1xf32>,
    } else {
    }
    %c0 = arith.constant 0 : index
    %c0_2 = arith.constant 0 : index
    %c0_3 = arith.constant 0 : index
    %5 = vector.load %arg2[%c0, %c0_2, %c0_3] : memref<1x32x256xf32, #tpu.memory_space<vmem>>, vector<1x32x256xf32>
    %6 = vector.shape_cast %5 : vector<1x32x256xf32> to vector<32x256xf32>
    %c0_4 = arith.constant 0 : index
    %c0_5 = arith.constant 0 : index
    %7 = vector.load %arg3[%c0_4, %c0_5] : memref<64x32xf32, #tpu.memory_space<vmem>>, vector<64x32xf32>
    %cst = arith.constant dense<0.000000e+00> : vector<64x256xf32>
    %8 = tpu.matmul %7, %6, %cst {dimension_numbers = #tpu.dot_dimension_numbers<[1], [0], [0], [1], [0, 0, 1, 1], [], []>} : vector<64x32xf32>, vector<32x256xf32>, vector<64x256xf32> -> vector<64x256xf32>
    %c0_6 = arith.constant 0 : index
    %c0_7 = arith.constant 0 : index
    %c0_8 = arith.constant 0 : index
    %9 = vector.load %arg4[%c0_6, %c0_7, %c0_8] : memref<2x64x1xf32, #tpu.memory_space<vmem>>, vector<1x64x1xf32>
    %10 = vector.shape_cast %9 : vector<1x64x1xf32> to vector<64x1xf32>
    %cst_9 = arith.constant dense<0.000000e+00> : vector<64xf32>
    %11 = vector.multi_reduction <add>, %8, %cst_9 [1] : vector<64x256xf32> to vector<64xf32>
    %12 = vector.shape_cast %11 : vector<64xf32> to vector<64x1xf32>
    %13 = arith.addf %10, %12 : vector<64x1xf32>
    %c0_10 = arith.constant 0 : index
    %c0_11 = arith.constant 0 : index
    %c0_12 = arith.constant 0 : index
    %14 = vector.load %arg4[%c0_10, %c0_11, %c0_12] : memref<2x64x1xf32, #tpu.memory_space<vmem>>, vector<1x64x1xf32>
    %15 = vector.shape_cast %14 : vector<1x64x1xf32> to vector<64x1xf32>
    %16 = vector.shape_cast %13 : vector<64x1xf32> to vector<1x64x1xf32>
    tpu.vector_store %arg4[%c0_10, %c0_11, %c0_12], %16 {strides = array<i32>} : memref<2x64x1xf32, #tpu.memory_space<vmem>>, vector<1x64x1xf32>,
    %c1 = arith.constant 1 : index
    %c0_13 = arith.constant 0 : index
    %c0_14 = arith.constant 0 : index
    %17 = vector.load %arg4[%c1, %c0_13, %c0_14] : memref<2x64x1xf32, #tpu.memory_space<vmem>>, vector<1x64x1xf32>
    %18 = vector.shape_cast %17 : vector<1x64x1xf32> to vector<64x1xf32>
    %19 = arith.mulf %8, %8 : vector<64x256xf32>
    %cst_15 = arith.constant dense<0.000000e+00> : vector<64xf32>
    %20 = vector.multi_reduction <add>, %19, %cst_15 [1] : vector<64x256xf32> to vector<64xf32>
    %21 = vector.shape_cast %20 : vector<64xf32> to vector<64x1xf32>
    %22 = arith.addf %18, %21 : vector<64x1xf32>
    %c1_16 = arith.constant 1 : index
    %c0_17 = arith.constant 0 : index
    %c0_18 = arith.constant 0 : index
    %23 = vector.load %arg4[%c1_16, %c0_17, %c0_18] : memref<2x64x1xf32, #tpu.memory_space<vmem>>, vector<1x64x1xf32>
    %24 = vector.shape_cast %23 : vector<1x64x1xf32> to vector<64x1xf32>
    %25 = vector.shape_cast %22 : vector<64x1xf32> to vector<1x64x1xf32>
    tpu.vector_store %arg4[%c1_16, %c0_17, %c0_18], %25 {strides = array<i32>} : memref<2x64x1xf32, #tpu.memory_space<vmem>>, vector<1x64x1xf32>,
    return
  }
  func.func @transform_0(%arg0: i32, %arg1: i32) -> (i32, i32, i32) {
    %c0_i32 = arith.constant 0 : i32
    %c0_i32_0 = arith.constant 0 : i32
    return %arg0, %c0_i32, %arg1 : i32, i32, i32
  }
  func.func @transform_1(%arg0: i32, %arg1: i32) -> (i32, i32) {
    %c0_i32 = arith.constant 0 : i32
    %c0_i32_0 = arith.constant 0 : i32
    %c0_i32_1 = arith.constant 0 : i32
    return %c0_i32, %c0_i32_0 : i32, i32
  }
  func.func @transform_2(%arg0: i32, %arg1: i32) -> (i32, i32, i32) {
    %c0_i32 = arith.constant 0 : i32
    %c0_i32_0 = arith.constant 0 : i32
    %c0_i32_1 = arith.constant 0 : i32
    %c0_i32_2 = arith.constant 0 : i32
    return %c0_i32, %c0_i32_0, %c0_i32_1 : i32, i32, i32
  }
}

module attributes {stable_mosaic.version = 11 : i64} {
  func.func @_norm_kernel(%arg0: i32, %arg1: i32, %arg2: memref<1x32x256xf32, #tpu.memory_space<vmem>>, %arg3: memref<64x32xf32, #tpu.memory_space<vmem>>, %arg4: memref<2x64x1xf32, #tpu.memory_space<vmem>>, %arg5: memref<1x64x256xf32, #tpu.memory_space<vmem>>) attributes {dimension_semantics = [#tpu.dimension_semantics<parallel>, #tpu.dimension_semantics<parallel>], iteration_bounds = array<i64: 2, 1>, scalar_prefetch = 0 : i64, scratch_operands = 0 : i64, tpu.core_type = #tpu.core_type<tc>, window_params = [{transform_indices = @transform_0, window_bounds = array<i64: 1, 32, 256>}, {pipeline_mode = #tpu.pipeline_mode<synchronous>, transform_indices = @transform_1, window_bounds = array<i64: 64, 32>}, {pipeline_mode = #tpu.pipeline_mode<synchronous>, transform_indices = @transform_2, window_bounds = array<i64: 2, 64, 1>}, {transform_indices = @transform_3, window_bounds = array<i64: 1, 64, 256>}]} {
    %c0 = arith.constant 0 : index
    %c0_0 = arith.constant 0 : index
    %c0_1 = arith.constant 0 : index
    %0 = vector.load %arg2[%c0, %c0_0, %c0_1] : memref<1x32x256xf32, #tpu.memory_space<vmem>>, vector<1x32x256xf32>
    %1 = vector.shape_cast %0 : vector<1x32x256xf32> to vector<32x256xf32>
    %c0_2 = arith.constant 0 : index
    %c0_3 = arith.constant 0 : index
    %2 = vector.load %arg3[%c0_2, %c0_3] : memref<64x32xf32, #tpu.memory_space<vmem>>, vector<64x32xf32>
    %cst = arith.constant dense<0.000000e+00> : vector<64x256xf32>
    %3 = tpu.matmul %2, %1, %cst {dimension_numbers = #tpu.dot_dimension_numbers<[1], [0], [0], [1], [0, 0, 1, 1], [], []>} : vector<64x32xf32>, vector<32x256xf32>, vector<64x256xf32> -> vector<64x256xf32>
    %c0_4 = arith.constant 0 : index
    %c0_5 = arith.constant 0 : index
    %c0_6 = arith.constant 0 : index
    %4 = vector.load %arg4[%c0_4, %c0_5, %c0_6] : memref<2x64x1xf32, #tpu.memory_space<vmem>>, vector<1x64x1xf32>
    %5 = vector.shape_cast %4 : vector<1x64x1xf32> to vector<64x1xf32>
    %c1 = arith.constant 1 : index
    %c0_7 = arith.constant 0 : index
    %c0_8 = arith.constant 0 : index
    %6 = vector.load %arg4[%c1, %c0_7, %c0_8] : memref<2x64x1xf32, #tpu.memory_space<vmem>>, vector<1x64x1xf32>
    %7 = vector.shape_cast %6 : vector<1x64x1xf32> to vector<64x1xf32>
    %8 = vector.broadcast %5 : vector<64x1xf32> to vector<64x256xf32>
    %9 = arith.mulf %3, %8 : vector<64x256xf32>
    %10 = vector.broadcast %7 : vector<64x1xf32> to vector<64x256xf32>
    %11 = arith.addf %9, %10 : vector<64x256xf32>
    %cst_9 = arith.constant 0.000000e+00 : f32
    %12 = vector.broadcast %cst_9 : f32 to vector<64x256xf32>
    %13 = arith.maximumf %11, %12 : vector<64x256xf32>
    %c0_10 = arith.constant 0 : index
    %c0_11 = arith.constant 0 : index
    %c0_12 = arith.constant 0 : index
    %14 = vector.load %arg5[%c0_10, %c0_11, %c0_12] : memref<1x64x256xf32, #tpu.memory_space<vmem>>, vector<1x64x256xf32>
    %15 = vector.shape_cast %14 : vector<1x64x256xf32> to vector<64x256xf32>
    %16 = vector.shape_cast %13 : vector<64x256xf32> to vector<1x64x256xf32>
    tpu.vector_store %arg5[%c0_10, %c0_11, %c0_12], %16 {strides = array<i32>} : memref<1x64x256xf32, #tpu.memory_space<vmem>>, vector<1x64x256xf32>,
    return
  }
  func.func @transform_0(%arg0: i32, %arg1: i32) -> (i32, i32, i32) {
    %c0_i32 = arith.constant 0 : i32
    %c0_i32_0 = arith.constant 0 : i32
    return %arg0, %c0_i32, %arg1 : i32, i32, i32
  }
  func.func @transform_1(%arg0: i32, %arg1: i32) -> (i32, i32) {
    %c0_i32 = arith.constant 0 : i32
    %c0_i32_0 = arith.constant 0 : i32
    %c0_i32_1 = arith.constant 0 : i32
    return %c0_i32, %c0_i32_0 : i32, i32
  }
  func.func @transform_2(%arg0: i32, %arg1: i32) -> (i32, i32, i32) {
    %c0_i32 = arith.constant 0 : i32
    %c0_i32_0 = arith.constant 0 : i32
    %c0_i32_1 = arith.constant 0 : i32
    %c0_i32_2 = arith.constant 0 : i32
    return %c0_i32, %c0_i32_0, %c0_i32_1 : i32, i32, i32
  }
  func.func @transform_3(%arg0: i32, %arg1: i32) -> (i32, i32, i32) {
    %c0_i32 = arith.constant 0 : i32
    %c0_i32_0 = arith.constant 0 : i32
    return %arg0, %c0_i32, %arg1 : i32, i32, i32
  }
}

</mosaic_0001>

<bundles_post_ra>
// kernel: mlpnet_forward.4
= control target key start
LH: loop header
LB: loop body
LE: loop exit
PB: predicated region body
PF: predicated region fallthrough
CT: control target
= control target key end

     0   :  { %s472_s9 = smov 0   ;;  %s474_s10 = smov 0   ;;  %s594_s0 = inlined_call_operand.vmem [shape: f32[2,8,256], index: 0, kind: input, shape index: {}]   ;;  %s595_s1 = inlined_call_operand.vmem [shape: f32[32,8], index: 1, kind: input, shape index: {}]   ;;  %s596_s2 = inlined_call_operand.vmem [shape: f32[2,32,1], index: 2, kind: output, shape index: {}]  }
   0x1   :  { %s476_s11 = smov 0  }
   0x2 LB: > { %s24_s12 = sadd.s32 1, %s449_s10  ;;  %p383_p0 = scmp.ge.s32.totalorder %s453_s11, 1  ;;  %s453_s11 = sphi %s476_s11, %s12_s11   ;;  %s449_s10 = sphi %s474_s10, %s598_s10   ;;  %s445_s9 = sphi %s472_s9, %s597_s9  }
   0x3   : > { %p26_p1 = scmp.ge.s32.totalorder %s24_s12, 2  ;;  %p126_p2 = scmp.lt.s32.totalorder %s453_s11, 3 }
   0x5   : > { %s600_s12 = smov (%p26_p1, %s24_s12), 0  ;;  %p127_p3 = pnand %p383_p0, %p126_p2 }
   0x6   : > { %p148_p4 = scmp.lt.s32.totalorder (!%p127_p3), %s445_s9, 1  ;;  %p157_p5 = scmp.eq.s32.totalorder (!%p127_p3), %s445_s9, 0 }
   0x7   : > { %130 = sbr.rel (%p127_p3) target bundleno = 397 (0x18d), region = 28 }
   0xe   : > { %s602_s9 = smov (!%p148_p4, %s445_s9), 1  ;;  %162 = sbr.rel (!%p157_p5) target bundleno = 21 (0x15), region = 32 }
   0xf   : > { %s401_s13 = sshll.u32 %s602_s9, 4  ;;  %vm163_vm0 = vcmask (%p157_p5), 7168   ;;  %v455_v0 = vmov (%p157_p5), 0.0  }
  0x10   : > { %s155_s16 = scalar_lea.vmem %s594_s0, %s401_s13  ;;  %164 = vst.msk [vmem:[%s596_s2] sm:$0xff] (%p157_p5), %vm163_vm0, %v455_v0  ;;  %165 = vst.msk [vmem:[%s596_s2 + $0x8] sm:$0xff] (%p157_p5), %vm163_vm0, %v455_v0 }
  0x11   : > { %166 = vst.msk [vmem:[%s596_s2 + $0x10] sm:$0xff] (%p157_p5), %vm163_vm0, %v455_v0  ;;  %167 = vst.msk [vmem:[%s596_s2 + $0x18] sm:$0xff] (%p157_p5), %vm163_vm0, %v455_v0 }
  0x12   : > { %168 = vst.msk [vmem:[%s596_s2 + $0x20] sm:$0xff] (%p157_p5), %vm163_vm0, %v455_v0  ;;  %169 = vst.msk [vmem:[%s596_s2 + $0x28] sm:$0xff] (%p157_p5), %vm163_vm0, %v455_v0 }
  0x13   : > { %170 = vst.msk [vmem:[%s596_s2 + $0x30] sm:$0xff] (%p157_p5), %vm163_vm0, %v455_v0  ;;  %171 = vst.msk [vmem:[%s596_s2 + $0x38] sm:$0xff] (%p157_p5), %vm163_vm0, %v455_v0 }
  0x15 PF: > { %v173_v1 = vld [vmem:[%s155_s16 + $0x8] sm:$0xff]  ;;  %v172_v2 = vld [vmem:[%s155_s16] sm:$0xff]  ;;  %vm178_vm1 = vcmask 64512   ;;  %v176_v4 = vld [vmem:[%s595_s1 + $0x10] sm:$0xff]  ;;  %v456_v5 = vmov 0.0   ;;  %vm300_vm2 = vcmask 7168  }
  0x16   : > { %191 = vmatprep.subr.mxu0 %v173_v1  ;;  %403 = vmatprep.subr.mxu1 %v173_v1  ;;  %v174_v3 = vld [vmem:[%s595_s1] sm:$0xff]  ;;  %v177_v6 = vld [vmem:[%s595_s1 + $0x18] sm:$0xff]  ;;  %v175_v7 = vld [vmem:[%s595_s1 + $0x8] sm:$0xff] }
  0x17   : > { %192 = vmatpush1.msra.mxu0 %v172_v2  ;;  %404 = vmatpush1.msra.mxu1 %v172_v2  ;;  %v280_v33 = vld [vmem:[%s596_s2] sm:$0xff]  ;;  %v281_v45 = vld [vmem:[%s596_s2 + $0x8] sm:$0xff] }
  0x18   : > { %255 = vmatprep.mubr.f32.mxu0 %v456_v5  ;;  %267 = vmatprep.mubr.f32.mxu1 %v456_v5  ;;  %v282_v32 = vld [vmem:[%s596_s2 + $0x10] sm:$0xff]  ;;  %v283_v38 = vld [vmem:[%s596_s2 + $0x18] sm:$0xff] }
  0x19   : > { %387 = vmatmul.mubr.msk.f32.vlgmr.msra.gmra.mrb[0].mxu0 %vm178_vm1, %v174_v3  ;;  %389 = vmatmul.mubr.msk.f32.vlgmr.msra.gmra.mrb[0].mxu1 %vm178_vm1, %v176_v4  ;;  %v391_v39 = vld [vmem:[%s596_s2 + $0x20] sm:$0xff]  ;;  %v392_v44 = vld [vmem:[%s596_s2 + $0x28] sm:$0xff] }
  0x1a   : > { %273 = vmatprep.mubr.f32.mxu1 %v456_v5  ;;  %261 = vmatprep.mubr.f32.mxu0 %v456_v5  ;;  %v394_v50 = vld [vmem:[%s596_s2 + $0x38] sm:$0xff]  ;;  %v393_v51 = vld [vmem:[%s596_s2 + $0x30] sm:$0xff] }
  0x1d   : > { %390 = vmatmul.mubr.msk.f32.gmra.mrb[2].mxu1 %vm178_vm1, %v177_v6  ;;  %388 = vmatmul.mubr.msk.f32.gmra.mrb[2].mxu0 %vm178_vm1, %v175_v7 }
  0xec   : > { %v257_v8 = vpop.f32.mrb[0].mxu0  ;;  %v269_v9 = vpop.f32.mrb[0].mxu1 }
  0xed   : > { %v310_v10 = vmul.f32 %v257_v8, %v257_v8  ;;  %v314_v11 = vmul.f32 %v269_v9, %v269_v9  ;;  %v259_v12 = vpop.f32.mrb[1].mxu0  ;;  %v271_v13 = vpop.f32.mrb[1].mxu1 }
  0xee   : > { %v311_v14 = vmul.f32 %v259_v12, %v259_v12  ;;  %v315_v15 = vmul.f32 %v271_v13, %v271_v13  ;;  %v290_v16 = vadd.f32 %v271_v13, %v269_v9  ;;  %v284_v17 = vadd.f32 %v259_v12, %v257_v8 }
  0xf0   : > { %291 = vadd.xlane.f32.xlu1 %v290_v16  ;;  %v275_v18 = vpop.f32.mrb[2].mxu1  ;;  %285 = vadd.xlane.f32.xlu0 %v284_v17  ;;  %v263_v19 = vpop.f32.mrb[2].mxu0  ;;  %v318_v20 = vadd.f32 %v311_v14, %v310_v10  ;;  %v324_v21 = vadd.f32 %v315_v15, %v314_v11 }
  0xf1   : > { %v316_v22 = vmul.f32 %v275_v18, %v275_v18  ;;  %v312_v23 = vmul.f32 %v263_v19, %v263_v19  ;;  %v277_v24 = vpop.f32.mrb[3].mxu1  ;;  %v265_v25 = vpop.f32.mrb[3].mxu0 }
  0xf2   : > { %v293_v26 = vadd.f32 %v277_v24, %v275_v18  ;;  %v317_v27 = vmul.f32 %v277_v24, %v277_v24  ;;  %v287_v28 = vadd.f32 %v265_v25, %v263_v19  ;;  %v313_v29 = vmul.f32 %v265_v25, %v265_v25 }
  0xf4   : > { %294 = vadd.xlane.f32.xlu1 %v293_v26  ;;  %319 = vadd.xlane.f32.xlu0 %v318_v20  ;;  %v321_v30 = vadd.f32 %v313_v29, %v312_v23  ;;  %v327_v31 = vadd.f32 %v317_v27, %v316_v22 }
  0xf8   : > { %322 = vadd.xlane.f32.xlu1 %v321_v30  ;;  %288 = vadd.xlane.f32.xlu0 %v287_v28 }
  0xfc   : > { %328 = vadd.xlane.f32.xlu1 %v327_v31  ;;  %325 = vadd.xlane.f32.xlu0 %v324_v21 }
 0x17d   : > { %v292_v34 = vpop.xlane.xlu1 %291  ;;  %v286_v35 = vpop.xlane.xlu0 %285 }
 0x17e   : > { %v298_v36 = vadd.f32 %v292_v34, %v282_v32  ;;  %v296_v37 = vadd.f32 %v286_v35, %v280_v33 }
 0x180   : > { %303 = vst.msk [vmem:[%s596_s2 + $0x10] sm:$0xff] %vm300_vm2, %v298_v36  ;;  %301 = vst.msk [vmem:[%s596_s2] sm:$0xff] %vm300_vm2, %v296_v37 }
 0x181   : > { %v295_v40 = vpop.xlane.xlu1 %294  ;;  %v320_v41 = vpop.xlane.xlu0 %319 }
 0x182   : > { %v299_v42 = vadd.f32 %v295_v40, %v283_v38  ;;  %v330_v43 = vadd.f32 %v391_v39, %v320_v41 }
 0x184   : > { %304 = vst.msk [vmem:[%s596_s2 + $0x18] sm:$0xff] %vm300_vm2, %v299_v42  ;;  %395 = vst.msk [vmem:[%s596_s2 + $0x20] sm:$0xff] %vm300_vm2, %v330_v43 }
 0x185   : > { %v323_v46 = vpop.xlane.xlu1 %322  ;;  %v289_v47 = vpop.xlane.xlu0 %288 }
 0x186   : > { %v331_v48 = vadd.f32 %v392_v44, %v323_v46  ;;  %v297_v49 = vadd.f32 %v289_v47, %v281_v45 }
 0x188   : > { %396 = vst.msk [vmem:[%s596_s2 + $0x28] sm:$0xff] %vm300_vm2, %v331_v48  ;;  %302 = vst.msk [vmem:[%s596_s2 + $0x8] sm:$0xff] %vm300_vm2, %v297_v49 }
 0x189   : > { %v329_v52 = vpop.xlane.xlu1 %328  ;;  %v326_v53 = vpop.xlane.xlu0 %325 }
 0x18a   : > { %v333_v54 = vadd.f32 %v394_v50, %v329_v52  ;;  %v332_v55 = vadd.f32 %v393_v51, %v326_v53 }
 0x18c   : > { %398 = vst.msk [vmem:[%s596_s2 + $0x38] sm:$0xff] %vm300_vm2, %v333_v54  ;;  %397 = vst.msk [vmem:[%s596_s2 + $0x30] sm:$0xff] %vm300_vm2, %v332_v55 }
 0x18d PF: > { %s12_s11 = sadd.s32 1, %s453_s11   ;;  %s597_s9 = smov %s449_s10 }
 0x18e   : > { %p9_p6 = scmp.ge.s32.totalorder %s12_s11, 4   ;;  %s598_s10 = smov %s600_s12 }
 0x190   :  { %11 = sbr.rel (!%p9_p6) target bundleno = 2 (0x2), region = 59 }

// kernel: mlpnet_forward.5
= control target key start
LH: loop header
LB: loop body
LE: loop exit
PB: predicated region body
PF: predicated region fallthrough
CT: control target
= control target key end

     0   :  { %s583_s12 = smov 0   ;;  %s585_s13 = smov 0   ;;  %s670_s0 = inlined_call_operand.vmem [shape: f32[2,8,256], index: 0, kind: input, shape index: {}]   ;;  %s671_s1 = inlined_call_operand.vmem [shape: f32[32,8], index: 1, kind: input, shape index: {}]   ;;  %s672_s2 = inlined_call_operand.vmem [shape: f32[2,32,1], index: 2, kind: input, shape index: {}]   ;;  %s673_s3 = inlined_call_operand.vmem [shape: f32[2,32,256], index: 3, kind: output, shape index: {}]  }
   0x1   :  { %s587_s14 = smov 0  }
   0x2 LB: > { %s25_s15 = sadd.s32 1, %s555_s13  ;;  %p490_p0 = scmp.ge.s32.totalorder %s559_s14, 1  ;;  %s559_s14 = sphi %s587_s14, %s13_s14   ;;  %s555_s13 = sphi %s585_s13, %s675_s13   ;;  %s551_s12 = sphi %s583_s12, %s674_s12  }
   0x3   : > { %p27_p1 = scmp.ge.s32.totalorder %s25_s15, 2  ;;  %p158_p2 = scmp.lt.s32.totalorder %s559_s14, 3 }
   0x5   : > { %s677_s15 = smov (%p27_p1, %s25_s15), 0  ;;  %p159_p3 = pnand %p490_p0, %p158_p2 }
   0x6   : > { %p191_p4 = scmp.lt.s32.totalorder (!%p159_p3), %s551_s12, 1  ;;  %v561_v0 = vmov (!%p159_p3), 0.0   ;;  %v320_v1 = vld [vmem:[%s672_s2 + $0x10] sm:$0xff] (!%p159_p3)  ;;  %v318_v2 = vld [vmem:[%s672_s2] sm:$0xff] (!%p159_p3)  ;;  %v562_v3 = vmov (!%p159_p3), 0   ;;  %vm216_vm0 = vcmask (!%p159_p3), 64512  }
   0x7   : > { %162 = sbr.rel (%p159_p3) target bundleno = 244 (0xf4), region = 32  ;;  %293 = vmatprep.mubr.f32.mxu0 (!%p159_p3), %v561_v0  ;;  %305 = vmatprep.mubr.f32.mxu1 (!%p159_p3), %v561_v0  ;;  %v212_v4 = vld [vmem:[%s671_s1] sm:$0xff] (!%p159_p3)  ;;  %v214_v7 = vld [vmem:[%s671_s1 + $0x10] sm:$0xff] (!%p159_p3)  ;;  %v321_v8 = vld [vmem:[%s672_s2 + $0x18] sm:$0xff] (!%p159_p3) }
   0x8   : > { %536 = vset.pattern.permute.xlu1 (!%p159_p3), %v562_v3  ;;  %535 = vset.pattern.permute.xlu0 (!%p159_p3), %v562_v3  ;;  %v319_v9 = vld [vmem:[%s672_s2 + $0x8] sm:$0xff] (!%p159_p3)  ;;  %v215_v11 = vld [vmem:[%s671_s1 + $0x18] sm:$0xff] (!%p159_p3)  ;;  %v499_v13 = vld [vmem:[%s672_s2 + $0x20] sm:$0xff] (!%p159_p3) }
   0x9   : > { %339 = vperm.xlu1 (!%p159_p3), %536, %v320_v1   ;;  %329 = vperm.xlu0 (!%p159_p3), %535, %v318_v2   ;;  %v213_v10 = vld [vmem:[%s671_s1 + $0x8] sm:$0xff] (!%p159_p3)  ;;  %v502_v14 = vld [vmem:[%s672_s2 + $0x38] sm:$0xff] (!%p159_p3)  ;;  %v501_v15 = vld [vmem:[%s672_s2 + $0x30] sm:$0xff] (!%p159_p3) }
   0xa   : > { %v500_v12 = vld [vmem:[%s672_s2 + $0x28] sm:$0xff] (!%p159_p3) }
   0xd   : > { %344 = vperm.xlu1 (!%p159_p3), %536, %v321_v8   ;;  %334 = vperm.xlu0 (!%p159_p3), %535, %v319_v9  }
   0xe   : > { %s679_s12 = smov (!%p191_p4, %s551_s12), 1 }
   0xf   : > { %s505_s20 = sshll.u32 %s679_s12, 4  ;;  %s506_s21 = sshll.u32 %s679_s12, 6 }
  0x10   : > { %s198_s23 = scalar_lea.vmem %s670_s0, %s505_s20  ;;  %s651_s24 = scalar_lea.vmem %s673_s3, %s506_s21 }
  0x11   : > { %v211_v5 = vld [vmem:[%s198_s23 + $0x8] sm:$0xff]  ;;  %v210_v6 = vld [vmem:[%s198_s23] sm:$0xff]  ;;  %362 = vperm.xlu1 %536, %v500_v12   ;;  %357 = vperm.xlu0 %535, %v499_v13  }
  0x12   : > { %229 = vmatprep.subr.mxu0 %v211_v5  ;;  %507 = vmatprep.subr.mxu1 %v211_v5 }
  0x13   : > { %230 = vmatpush1.msra.mxu0 %v210_v6  ;;  %508 = vmatpush1.msra.mxu1 %v210_v6 }
  0x14   : > { %495 = vmatmul.mubr.msk.f32.vlgmr.msra.gmra.mrb[0].mxu0 %vm216_vm0, %v212_v4  ;;  %497 = vmatmul.mubr.msk.f32.vlgmr.msra.gmra.mrb[0].mxu1 %vm216_vm0, %v214_v7 }
  0x15   : > { %299 = vmatprep.mubr.f32.mxu0 %v561_v0  ;;  %311 = vmatprep.mubr.f32.mxu1 %v561_v0 }
  0x16   : > { %372 = vperm.xlu1 %536, %v502_v14   ;;  %367 = vperm.xlu0 %535, %v501_v15  }
  0x18   : > { %496 = vmatmul.mubr.msk.f32.gmra.mrb[2].mxu0 %vm216_vm0, %v213_v10  ;;  %498 = vmatmul.mubr.msk.f32.gmra.mrb[2].mxu1 %vm216_vm0, %v215_v11 }
  0x88   : > { %v330_v16 = vpop.permute.xlu0 %329  ;;  %v340_v17 = vpop.permute.xlu1 %339 }
  0x8c   : > { %v335_v18 = vpop.permute.xlu0 %334  ;;  %v345_v19 = vpop.permute.xlu1 %344 }
  0x90   : > { %v358_v20 = vpop.permute.xlu0 %357  ;;  %v363_v21 = vpop.permute.xlu1 %362 }
  0x95   : > { %v368_v28 = vpop.permute.xlu0 %367  ;;  %v373_v43 = vpop.permute.xlu1 %372 }
  0xe7   : > { %v295_v22 = vpop.f32.mrb[0].mxu0  ;;  %v307_v23 = vpop.f32.mrb[0].mxu1 }
  0xe8   : > { %v347_v24 = vmul.f32 %v330_v16, %v295_v22  ;;  %v351_v25 = vmul.f32 %v340_v17, %v307_v23  ;;  %v297_v26 = vpop.f32.mrb[1].mxu0  ;;  %v309_v27 = vpop.f32.mrb[1].mxu1 }
  0xe9   : > { %v348_v29 = vmul.f32 %v330_v16, %v297_v26  ;;  %v352_v30 = vmul.f32 %v340_v17, %v309_v27 }
  0xea   : > { %v375_v31 = vadd.f32 %v358_v20, %v347_v24  ;;  %v379_v32 = vadd.f32 %v368_v28, %v351_v25 }
  0xeb   : > { %v376_v33 = vadd.f32 %v358_v20, %v348_v29  ;;  %v380_v34 = vadd.f32 %v368_v28, %v352_v30  ;;  %v301_v35 = vpop.f32.mrb[2].mxu0  ;;  %v313_v36 = vpop.f32.mrb[2].mxu1 }
  0xec   : > { %v383_v37 = vmax.f32 %v375_v31, 0.0  ;;  %v387_v38 = vmax.f32 %v379_v32, 0.0  ;;  %v349_v39 = vmul.f32 %v335_v18, %v301_v35  ;;  %v353_v40 = vmul.f32 %v345_v19, %v313_v36  ;;  %v303_v41 = vpop.f32.mrb[3].mxu0  ;;  %v315_v42 = vpop.f32.mrb[3].mxu1 }
  0xed   : > { %v384_v44 = vmax.f32 %v376_v33, 0.0  ;;  %v388_v45 = vmax.f32 %v380_v34, 0.0  ;;  %v350_v46 = vmul.f32 %v335_v18, %v303_v41  ;;  %v354_v47 = vmul.f32 %v345_v19, %v315_v42 }
  0xee   : > { %391 = vst [vmem:[%s651_s24] sm:$0xff] %v383_v37  ;;  %395 = vst [vmem:[%s651_s24 + $0x20] sm:$0xff] %v387_v38  ;;  %v377_v48 = vadd.f32 %v363_v21, %v349_v39  ;;  %v381_v49 = vadd.f32 %v373_v43, %v353_v40 }
  0xef   : > { %392 = vst [vmem:[%s651_s24 + $0x8] sm:$0xff] %v384_v44  ;;  %396 = vst [vmem:[%s651_s24 + $0x28] sm:$0xff] %v388_v45  ;;  %v378_v50 = vadd.f32 %v363_v21, %v350_v46  ;;  %v382_v51 = vadd.f32 %v373_v43, %v354_v47 }
  0xf0   : > { %v385_v52 = vmax.f32 %v377_v48, 0.0  ;;  %v389_v53 = vmax.f32 %v381_v49, 0.0 }
  0xf1   : > { %v386_v54 = vmax.f32 %v378_v50, 0.0  ;;  %v390_v55 = vmax.f32 %v382_v51, 0.0 }
  0xf2   : > { %393 = vst [vmem:[%s651_s24 + $0x10] sm:$0xff] %v385_v52  ;;  %397 = vst [vmem:[%s651_s24 + $0x30] sm:$0xff] %v389_v53 }
  0xf3   : > { %394 = vst [vmem:[%s651_s24 + $0x18] sm:$0xff] %v386_v54  ;;  %398 = vst [vmem:[%s651_s24 + $0x38] sm:$0xff] %v390_v55 }
  0xf4 PF: > { %s13_s14 = sadd.s32 1, %s559_s14   ;;  %s674_s12 = smov %s555_s13 }
  0xf5   : > { %p10_p5 = scmp.ge.s32.totalorder %s13_s14, 4   ;;  %s675_s13 = smov %s677_s15 }
  0xf7   :  { %12 = sbr.rel (!%p10_p5) target bundleno = 2 (0x2), region = 63 }

// kernel: mlpnet_forward.6
= control target key start
LH: loop header
LB: loop body
LE: loop exit
PB: predicated region body
PF: predicated region fallthrough
CT: control target
= control target key end

     0   :  { %s604_s9 = smov 0   ;;  %s606_s10 = smov 0   ;;  %s852_s0 = inlined_call_operand.vmem [shape: f32[2,32,256], index: 0, kind: input, shape index: {}]   ;;  %s853_s1 = inlined_call_operand.vmem [shape: f32[64,32], index: 1, kind: input, shape index: {}]   ;;  %s854_s2 = inlined_call_operand.vmem [shape: f32[2,64,1], index: 2, kind: output, shape index: {}]  }
   0x1   :  { %s608_s11 = smov 0  }
   0x2 LB: > { %s24_s12 = sadd.s32 1, %s581_s10  ;;  %p493_p0 = scmp.ge.s32.totalorder %s585_s11, 1  ;;  %s585_s11 = sphi %s608_s11, %s12_s11   ;;  %s581_s10 = sphi %s606_s10, %s856_s10   ;;  %s577_s9 = sphi %s604_s9, %s855_s9  }
   0x3   : > { %p26_p1 = scmp.ge.s32.totalorder %s24_s12, 2  ;;  %p126_p2 = scmp.lt.s32.totalorder %s585_s11, 3 }
   0x5   : > { %s858_s12 = smov (%p26_p1, %s24_s12), 0  ;;  %p127_p3 = pnand %p493_p0, %p126_p2 }
   0x6   : > { %p148_p4 = scmp.lt.s32.totalorder (!%p127_p3), %s577_s9, 1  ;;  %p157_p5 = scmp.eq.s32.totalorder (!%p127_p3), %s577_s9, 0 }
   0x7   : > { %130 = sbr.rel (%p127_p3) target bundleno = 427 (0x1ab), region = 28 }
   0xe   : > { %s860_s9 = smov (!%p148_p4, %s577_s9), 1  ;;  %162 = sbr.rel (!%p157_p5) target bundleno = 24 (0x18), region = 32 }
   0xf   : > { %s523_s13 = sshll.u32 %s860_s9, 6  ;;  %vm163_vm0 = vcmask (%p157_p5), 7168   ;;  %v587_v0 = vmov (%p157_p5), 0.0  }
  0x10   : > { %s625_s16 = scalar_lea.vmem %s852_s0, %s523_s13  ;;  %164 = vst.msk [vmem:[%s854_s2] sm:$0xff] (%p157_p5), %vm163_vm0, %v587_v0  ;;  %165 = vst.msk [vmem:[%s854_s2 + $0x8] sm:$0xff] (%p157_p5), %vm163_vm0, %v587_v0 }
  0x11   : > { %166 = vst.msk [vmem:[%s854_s2 + $0x10] sm:$0xff] (%p157_p5), %vm163_vm0, %v587_v0  ;;  %167 = vst.msk [vmem:[%s854_s2 + $0x18] sm:$0xff] (%p157_p5), %vm163_vm0, %v587_v0 }
  0x12   : > { %168 = vst.msk [vmem:[%s854_s2 + $0x20] sm:$0xff] (%p157_p5), %vm163_vm0, %v587_v0  ;;  %169 = vst.msk [vmem:[%s854_s2 + $0x28] sm:$0xff] (%p157_p5), %vm163_vm0, %v587_v0 }
  0x13   : > { %170 = vst.msk [vmem:[%s854_s2 + $0x30] sm:$0xff] (%p157_p5), %vm163_vm0, %v587_v0  ;;  %171 = vst.msk [vmem:[%s854_s2 + $0x38] sm:$0xff] (%p157_p5), %vm163_vm0, %v587_v0 }
  0x14   : > { %172 = vst.msk [vmem:[%s854_s2 + $0x40] sm:$0xff] (%p157_p5), %vm163_vm0, %v587_v0  ;;  %173 = vst.msk [vmem:[%s854_s2 + $0x48] sm:$0xff] (%p157_p5), %vm163_vm0, %v587_v0 }
  0x15   : > { %174 = vst.msk [vmem:[%s854_s2 + $0x50] sm:$0xff] %vm163_vm0, %v587_v0  ;;  %175 = vst.msk [vmem:[%s854_s2 + $0x58] sm:$0xff] %vm163_vm0, %v587_v0 }
  0x16   : > { %176 = vst.msk [vmem:[%s854_s2 + $0x60] sm:$0xff] %vm163_vm0, %v587_v0  ;;  %177 = vst.msk [vmem:[%s854_s2 + $0x68] sm:$0xff] %vm163_vm0, %v587_v0 }
  0x17   : > { %178 = vst.msk [vmem:[%s854_s2 + $0x70] sm:$0xff] %vm163_vm0, %v587_v0  ;;  %179 = vst.msk [vmem:[%s854_s2 + $0x78] sm:$0xff] %vm163_vm0, %v587_v0 }
  0x18 PF: > { %v181_v1 = vld [vmem:[%s625_s16 + $0x8] sm:$0xff]  ;;  %v183_v2 = vld [vmem:[%s625_s16 + $0x18] sm:$0xff]  ;;  %v180_v3 = vld [vmem:[%s625_s16] sm:$0xff]  ;;  %v588_v8 = vmov 0.0   ;;  %vm196_vm1 = vcmask 261120   ;;  %vm374_vm2 = vcmask 7168  }
  0x19   : > { %v525_v4 = vpack.c.bf16 %v183_v2, %v181_v1  ;;  %v182_v5 = vld [vmem:[%s625_s16 + $0x10] sm:$0xff]  ;;  %v185_v6 = vld [vmem:[%s625_s16 + $0x28] sm:$0xff]  ;;  %v187_v7 = vld [vmem:[%s625_s16 + $0x38] sm:$0xff]  ;;  %285 = vmatprep.mubr.f32.mxu0 %v588_v8  ;;  %309 = vmatprep.mubr.f32.mxu1 %v588_v8 }
  0x1a   : > { %v527_v9 = vpack.c.bf16 %v182_v5, %v180_v3  ;;  %v529_v10 = vpack.c.bf16 %v187_v7, %v185_v6  ;;  %v184_v11 = vld [vmem:[%s625_s16 + $0x20] sm:$0xff]  ;;  %v186_v12 = vld [vmem:[%s625_s16 + $0x30] sm:$0xff]  ;;  %v193_v16 = vld [vmem:[%s853_s1 + $0x28] sm:$0xff] }
  0x1b   : > { %526 = vmatprep.subr.bf16.mxu0 %v525_v4  ;;  %533 = vmatprep.subr.bf16.mxu1 %v525_v4  ;;  %v531_v13 = vpack.c.bf16 %v186_v12, %v184_v11  ;;  %v188_v14 = vld [vmem:[%s853_s1] sm:$0xff]  ;;  %v189_v17 = vld [vmem:[%s853_s1 + $0x8] sm:$0xff]  ;;  %v190_v18 = vld [vmem:[%s853_s1 + $0x10] sm:$0xff] }
  0x1c   : > { %528 = vmatpush1.bf16.msra.mxu0 %v527_v9  ;;  %535 = vmatpush1.bf16.msra.mxu1 %v527_v9  ;;  %v192_v15 = vld [vmem:[%s853_s1 + $0x20] sm:$0xff]  ;;  %v194_v19 = vld [vmem:[%s853_s1 + $0x30] sm:$0xff]  ;;  %v191_v20 = vld [vmem:[%s853_s1 + $0x18] sm:$0xff] }
  0x1d   : > { %530 = vmatprep.subr.bf16.mxu0 %v529_v10  ;;  %534 = vmatprep.subr.bf16.mxu1 %v529_v10  ;;  %v195_v21 = vld [vmem:[%s853_s1 + $0x38] sm:$0xff]  ;;  %v334_v6 = vld [vmem:[%s854_s2] sm:$0xff]  ;;  %v339_v9 = vld [vmem:[%s854_s2 + $0x28] sm:$0xff] }
  0x1e   : > { %v338_v10 = vld [vmem:[%s854_s2 + $0x20] sm:$0xff] }
  0x20   : > { %532 = vmatpush1.bf16.msra.mxu0 %v531_v13  ;;  %536 = vmatpush1.bf16.msra.mxu1 %v531_v13 }
  0x23   : > { %497 = vmatmul.mubr.msk.f32.vlgmr.msra.gmra.mrb[0].mxu0 %vm196_vm1, %v188_v14  ;;  %501 = vmatmul.mubr.msk.f32.vlgmr.msra.gmra.mrb[0].mxu1 %vm196_vm1, %v192_v15  ;;  %v505_v15 = vld [vmem:[%s854_s2 + $0x40] sm:$0xff] }
  0x24   : > { %315 = vmatprep.mubr.f32.mxu1 %v588_v8  ;;  %291 = vmatprep.mubr.f32.mxu0 %v588_v8 }
  0x27   : > { %502 = vmatmul.mubr.msk.f32.gmra.mrb[2].mxu1 %vm196_vm1, %v193_v16  ;;  %498 = vmatmul.mubr.msk.f32.gmra.mrb[2].mxu0 %vm196_vm1, %v189_v17  ;;  %v506_v16 = vld [vmem:[%s854_s2 + $0x48] sm:$0xff] }
  0x28   : > { %297 = vmatprep.mubr.f32.mxu0 %v588_v8  ;;  %321 = vmatprep.mubr.f32.mxu1 %v588_v8 }
  0x2b   : > { %499 = vmatmul.mubr.msk.f32.gmra.mrb[4].mxu0 %vm196_vm1, %v190_v18  ;;  %503 = vmatmul.mubr.msk.f32.gmra.mrb[4].mxu1 %vm196_vm1, %v194_v19 }
  0x2c   : > { %303 = vmatprep.mubr.f32.mxu0 %v588_v8  ;;  %327 = vmatprep.mubr.f32.mxu1 %v588_v8 }
  0x2f   : > { %500 = vmatmul.mubr.msk.f32.gmra.mrb[6].mxu0 %vm196_vm1, %v191_v20  ;;  %504 = vmatmul.mubr.msk.f32.gmra.mrb[6].mxu1 %vm196_vm1, %v195_v21  ;;  %v509_v21 = vld [vmem:[%s854_s2 + $0x60] sm:$0xff] }
  0xf6   : > { %v287_v22 = vpop.f32.mrb[0].mxu0  ;;  %v311_v23 = vpop.f32.mrb[0].mxu1 }
  0xf7   : > { %v392_v24 = vmul.f32 %v287_v22, %v287_v22  ;;  %v400_v25 = vmul.f32 %v311_v23, %v311_v23  ;;  %v289_v26 = vpop.f32.mrb[1].mxu0  ;;  %v313_v27 = vpop.f32.mrb[1].mxu1 }
  0xf8   : > { %v393_v28 = vmul.f32 %v289_v26, %v289_v26  ;;  %v401_v29 = vmul.f32 %v313_v27, %v313_v27  ;;  %v342_v30 = vadd.f32 %v289_v26, %v287_v22  ;;  %v354_v31 = vadd.f32 %v313_v27, %v311_v23  ;;  %v510_v22 = vld [vmem:[%s854_s2 + $0x68] sm:$0xff] }
  0xf9   : > { %v335_v27 = vld [vmem:[%s854_s2 + $0x8] sm:$0xff] }
  0xfa   : > { %v317_v32 = vpop.f32.mrb[2].mxu1  ;;  %343 = vadd.xlane.f32.xlu0 %v342_v30  ;;  %v293_v33 = vpop.f32.mrb[2].mxu0  ;;  %v408_v34 = vadd.f32 %v393_v28, %v392_v24  ;;  %v420_v35 = vadd.f32 %v401_v29, %v400_v25  ;;  %v336_v28 = vld [vmem:[%s854_s2 + $0x10] sm:$0xff] }
  0xfb   : > { %v402_v36 = vmul.f32 %v317_v32, %v317_v32  ;;  %v394_v37 = vmul.f32 %v293_v33, %v293_v33  ;;  %v319_v38 = vpop.f32.mrb[3].mxu1  ;;  %v295_v39 = vpop.f32.mrb[3].mxu0 }
  0xfc   : > { %v403_v40 = vmul.f32 %v319_v38, %v319_v38  ;;  %v395_v41 = vmul.f32 %v295_v39, %v295_v39  ;;  %v357_v42 = vadd.f32 %v319_v38, %v317_v32  ;;  %v345_v43 = vadd.f32 %v295_v39, %v293_v33  ;;  %v340_v33 = vld [vmem:[%s854_s2 + $0x30] sm:$0xff] }
  0xfd   : > { %v507_v39 = vld [vmem:[%s854_s2 + $0x50] sm:$0xff] }
  0xfe   : > { %358 = vadd.xlane.f32.xlu1 %v357_v42  ;;  %355 = vadd.xlane.f32.xlu0 %v354_v31  ;;  %v411_v44 = vadd.f32 %v395_v41, %v394_v37  ;;  %v299_v45 = vpop.f32.mrb[4].mxu0  ;;  %v423_v46 = vadd.f32 %v403_v40, %v402_v36  ;;  %v323_v47 = vpop.f32.mrb[4].mxu1  ;;  %v341_v40 = vld [vmem:[%s854_s2 + $0x38] sm:$0xff] }
  0xff   : > { %v396_v48 = vmul.f32 %v299_v45, %v299_v45  ;;  %v301_v49 = vpop.f32.mrb[5].mxu0  ;;  %v404_v50 = vmul.f32 %v323_v47, %v323_v47  ;;  %v325_v51 = vpop.f32.mrb[5].mxu1 }
 0x100   : > { %v397_v52 = vmul.f32 %v301_v49, %v301_v49  ;;  %v405_v53 = vmul.f32 %v325_v51, %v325_v51  ;;  %v348_v54 = vadd.f32 %v301_v49, %v299_v45  ;;  %v360_v55 = vadd.f32 %v325_v51, %v323_v47  ;;  %v511_v45 = vld [vmem:[%s854_s2 + $0x70] sm:$0xff]  ;;  %v512_v51 = vld [vmem:[%s854_s2 + $0x78] sm:$0xff] }
 0x102   : > { %409 = vadd.xlane.f32.xlu0 %v408_v34  ;;  %412 = vadd.xlane.f32.xlu1 %v411_v44  ;;  %v305_v56 = vpop.f32.mrb[6].mxu0  ;;  %v329_v57 = vpop.f32.mrb[6].mxu1  ;;  %v414_v58 = vadd.f32 %v397_v52, %v396_v48  ;;  %v426_v59 = vadd.f32 %v405_v53, %v404_v50  ;;  %v337_v34 = vld [vmem:[%s854_s2 + $0x18] sm:$0xff] }
 0x103   : > { %v398_v60 = vmul.f32 %v305_v56, %v305_v56  ;;  %v307_v61 = vpop.f32.mrb[7].mxu0  ;;  %v406_v62 = vmul.f32 %v329_v57, %v329_v57  ;;  %v331_v63 = vpop.f32.mrb[7].mxu1 }
 0x104   : > { %v351_v0 = vadd.f32 %v307_v61, %v305_v56  ;;  %v399_v1 = vmul.f32 %v307_v61, %v307_v61  ;;  %v363_v2 = vadd.f32 %v331_v63, %v329_v57  ;;  %v407_v3 = vmul.f32 %v331_v63, %v331_v63 }
 0x106   : > { %421 = vadd.xlane.f32.xlu0 %v420_v35  ;;  %424 = vadd.xlane.f32.xlu1 %v423_v46  ;;  %v417_v4 = vadd.f32 %v399_v1, %v398_v60  ;;  %v429_v5 = vadd.f32 %v407_v3, %v406_v62  ;;  %v508_v46 = vld [vmem:[%s854_s2 + $0x58] sm:$0xff] }
 0x10a   : > { %346 = vadd.xlane.f32.xlu0 %v345_v43  ;;  %349 = vadd.xlane.f32.xlu1 %v348_v54 }
 0x10e   : > { %361 = vadd.xlane.f32.xlu0 %v360_v55  ;;  %352 = vadd.xlane.f32.xlu1 %v351_v0 }
 0x112   : > { %415 = vadd.xlane.f32.xlu0 %v414_v58  ;;  %364 = vadd.xlane.f32.xlu1 %v363_v2 }
 0x116   : > { %427 = vadd.xlane.f32.xlu0 %v426_v59  ;;  %418 = vadd.xlane.f32.xlu1 %v417_v4 }
 0x11a   : > { %430 = vadd.xlane.f32.xlu1 %v429_v5 }
 0x187   : > { %v344_v7 = vpop.xlane.xlu0 %343 }
 0x188   : > { %v366_v8 = vadd.f32 %v344_v7, %v334_v6 }
 0x18a   : > { %375 = vst.msk [vmem:[%s854_s2] sm:$0xff] %vm374_vm2, %v366_v8 }
 0x18b   : > { %v359_v11 = vpop.xlane.xlu1 %358  ;;  %v356_v12 = vpop.xlane.xlu0 %355 }
 0x18c   : > { %v371_v13 = vadd.f32 %v359_v11, %v339_v9  ;;  %v370_v14 = vadd.f32 %v356_v12, %v338_v10 }
 0x18e   : > { %380 = vst.msk [vmem:[%s854_s2 + $0x28] sm:$0xff] %vm374_vm2, %v371_v13  ;;  %379 = vst.msk [vmem:[%s854_s2 + $0x20] sm:$0xff] %vm374_vm2, %v370_v14 }
 0x18f   : > { %v410_v17 = vpop.xlane.xlu0 %409  ;;  %v413_v18 = vpop.xlane.xlu1 %412 }
 0x190   : > { %v432_v19 = vadd.f32 %v505_v15, %v410_v17  ;;  %v433_v20 = vadd.f32 %v506_v16, %v413_v18 }
 0x192   : > { %513 = vst.msk [vmem:[%s854_s2 + $0x40] sm:$0xff] %vm374_vm2, %v432_v19  ;;  %514 = vst.msk [vmem:[%s854_s2 + $0x48] sm:$0xff] %vm374_vm2, %v433_v20 }
 0x193   : > { %v422_v23 = vpop.xlane.xlu0 %421  ;;  %v425_v24 = vpop.xlane.xlu1 %424 }
 0x194   : > { %v436_v25 = vadd.f32 %v509_v21, %v422_v23  ;;  %v437_v26 = vadd.f32 %v510_v22, %v425_v24 }
 0x196   : > { %517 = vst.msk [vmem:[%s854_s2 + $0x60] sm:$0xff] %vm374_vm2, %v436_v25  ;;  %518 = vst.msk [vmem:[%s854_s2 + $0x68] sm:$0xff] %vm374_vm2, %v437_v26 }
 0x197   : > { %v347_v29 = vpop.xlane.xlu0 %346  ;;  %v350_v30 = vpop.xlane.xlu1 %349 }
 0x198   : > { %v367_v31 = vadd.f32 %v347_v29, %v335_v27  ;;  %v368_v32 = vadd.f32 %v350_v30, %v336_v28 }
 0x19a   : > { %376 = vst.msk [vmem:[%s854_s2 + $0x8] sm:$0xff] %vm374_vm2, %v367_v31  ;;  %377 = vst.msk [vmem:[%s854_s2 + $0x10] sm:$0xff] %vm374_vm2, %v368_v32 }
 0x19b   : > { %v362_v35 = vpop.xlane.xlu0 %361  ;;  %v353_v36 = vpop.xlane.xlu1 %352 }
 0x19c   : > { %v372_v37 = vadd.f32 %v362_v35, %v340_v33  ;;  %v369_v38 = vadd.f32 %v353_v36, %v337_v34 }
 0x19e   : > { %381 = vst.msk [vmem:[%s854_s2 + $0x30] sm:$0xff] %vm374_vm2, %v372_v37  ;;  %378 = vst.msk [vmem:[%s854_s2 + $0x18] sm:$0xff] %vm374_vm2, %v369_v38 }
 0x19f   : > { %v416_v41 = vpop.xlane.xlu0 %415  ;;  %v365_v42 = vpop.xlane.xlu1 %364 }
 0x1a0   : > { %v434_v43 = vadd.f32 %v507_v39, %v416_v41  ;;  %v373_v44 = vadd.f32 %v365_v42, %v341_v40 }
 0x1a2   : > { %515 = vst.msk [vmem:[%s854_s2 + $0x50] sm:$0xff] %vm374_vm2, %v434_v43  ;;  %382 = vst.msk [vmem:[%s854_s2 + $0x38] sm:$0xff] %vm374_vm2, %v373_v44 }
 0x1a3   : > { %v428_v47 = vpop.xlane.xlu0 %427  ;;  %v419_v48 = vpop.xlane.xlu1 %418 }
 0x1a4   : > { %v438_v49 = vadd.f32 %v511_v45, %v428_v47  ;;  %v435_v50 = vadd.f32 %v508_v46, %v419_v48 }
 0x1a6   : > { %519 = vst.msk [vmem:[%s854_s2 + $0x70] sm:$0xff] %vm374_vm2, %v438_v49  ;;  %516 = vst.msk [vmem:[%s854_s2 + $0x58] sm:$0xff] %vm374_vm2, %v435_v50 }
 0x1a7   : > { %v431_v52 = vpop.xlane.xlu1 %430 }
 0x1a8   : > { %v439_v53 = vadd.f32 %v512_v51, %v431_v52 }
 0x1aa   : > { %520 = vst.msk [vmem:[%s854_s2 + $0x78] sm:$0xff] %vm374_vm2, %v439_v53 }
 0x1ab PF: > { %s12_s11 = sadd.s32 1, %s585_s11   ;;  %s855_s9 = smov %s581_s10 }
 0x1ac   : > { %p9_p6 = scmp.ge.s32.totalorder %s12_s11, 4   ;;  %s856_s10 = smov %s858_s12 }
 0x1ae   :  { %11 = sbr.rel (!%p9_p6) target bundleno = 2 (0x2), region = 59 }

// kernel: mlpnet_forward.7
= control target key start
LH: loop header
LB: loop body
LE: loop exit
PB: predicated region body
PF: predicated region fallthrough
CT: control target
= control target key end

     0   :  { %8 = vsyncpa [#allocation3], 0  ;;  %s1057_s0 = inlined_call_operand.vmem [shape: f32[2,32,256], index: 0, kind: input, shape index: {}]   ;;  %s1058_s1 = inlined_call_operand.vmem [shape: f32[64,32], index: 1, kind: input, shape index: {}]   ;;  %s1059_s2 = inlined_call_operand.vmem [shape: f32[2,64,1], index: 2, kind: input, shape index: {}]   ;;  %s1060_s3 = inlined_call_operand.hbm [shape: f32[2,64,256], index: 3, kind: output, shape index: {}]  }
   0x1   :  { %10 = vsyncpa [#allocation3 + $0x1], 0  ;;  %s819_s12 = smov 0   ;;  %s821_s13 = smov 0  }
   0x2   :  { %s823_s14 = smov 0   ;;  %s825_s15 = smov 0  }
   0x3   :  { %s827_s16 = smov 0   ;;  %s829_s17 = smov 0  }
   0x4 LB: > { %s610_s18 = sadd.s32 4294967295, %s792_s17   ;;  %s611_s19 = sadd.s32 4294967294, %s792_s17   ;;  %s792_s17 = sphi %s829_s17, %s16_s17   ;;  %s788_s16 = sphi %s827_s16, %s1067_s16   ;;  %s784_s15 = sphi %s825_s15, %s1066_s15   ;;  %s780_s14 = sphi %s823_s14, %s1065_s14   ;;  %s776_s13 = sphi %s821_s13, %s1064_s13   ;;  %s772_s12 = sphi %s819_s12, %s1063_s12  }
   0x5   : > { %s28_s20 = sadd.s32 1, %s788_s16  ;;  %s107_s21 = sadd.s32 1, %s780_s14 }
   0x6   : > { %p30_p0 = scmp.ge.s32.totalorder %s28_s20, 2  ;;  %p117_p1 = scmp.ne.s32.totalorder %s780_s14, %s776_s13 }
   0x7   : > { %p118_p2 = scmp.eq.s32.totalorder %s610_s18, 1  ;;  %p123_p3 = scmp.ne.s32.totalorder %s776_s13, %s772_s12 }
   0x8   : > { %s1069_s20 = smov (%p30_p0, %s28_s20), 0  ;;  %p124_p5 = scmp.eq.s32.totalorder %s611_s19, 1 }
   0x9   : > { %p859_p4 = por %p118_p2, %p117_p1  ;;  %s102_s23 = ssub.s32 %s788_s16, %s1069_s20 }
   0xa   : > { %p614_p6 = scmp.ge.s32.totalorder %s792_s17, 1  ;;  %p105_p7 = scmp.eq.s32.totalorder %s102_s23, 0 }
   0xb   : > { %p866_p8 = por %p124_p5, %p123_p3  ;;  %p161_p9 = scmp.lt.s32.totalorder %s792_s17, 3 }
   0xc   : > { %s872_s25 = scalar_select %p105_p7, %s780_s14, %s107_s21  }
   0xd   : > { %p162_p10 = pnand %p614_p6, %p161_p9 }
   0xe   : > { %p190_p11 = scmp.lt.s32.totalorder (!%p162_p10), %s784_s15, 1  ;;  %v794_v0 = vmov (!%p162_p10), 0.0   ;;  %v795_v1 = vmov (!%p162_p10), 0   ;;  %v356_v2 = vld [vmem:[%s1059_s2 + $0x10] sm:$0xff] (!%p162_p10)  ;;  %v354_v3 = vld [vmem:[%s1059_s2] sm:$0xff] (!%p162_p10)  ;;  %v357_v4 = vld [vmem:[%s1059_s2 + $0x18] sm:$0xff] (!%p162_p10) }
   0xf   : > { %165 = sbr.rel (%p162_p10) target bundleno = 283 (0x11b), region = 32  ;;  %305 = vmatprep.mubr.f32.mxu0 (!%p162_p10), %v794_v0  ;;  %329 = vmatprep.mubr.f32.mxu1 (!%p162_p10), %v794_v0  ;;  %v355_v5 = vld [vmem:[%s1059_s2 + $0x8] sm:$0xff] (!%p162_p10)  ;;  %v358_v18 = vld [vmem:[%s1059_s2 + $0x20] sm:$0xff] (!%p162_p10)  ;;  %v361_v20 = vld [vmem:[%s1059_s2 + $0x38] sm:$0xff] (!%p162_p10)  ;;  %vm216_vm0 = vcmask (!%p162_p10), 261120   ;;  %s186_s28 = sand.u32 (!%p162_p10), 1, %s776_s13  }
  0x10   : > { %713 = vset.pattern.permute.xlu1 (!%p162_p10), %v795_v1  ;;  %712 = vset.pattern.permute.xlu0 (!%p162_p10), %v795_v1  ;;  %v359_v17 = vld [vmem:[%s1059_s2 + $0x28] sm:$0xff] (!%p162_p10)  ;;  %v360_v21 = vld [vmem:[%s1059_s2 + $0x30] sm:$0xff] (!%p162_p10)  ;;  %v208_v22 = vld [vmem:[%s1058_s1] sm:$0xff] (!%p162_p10)  ;;  %s615_s29 = sshll.u32 (!%p162_p10), %s186_s28, 7  ;;  %s1011_s8 = scalar_lea.sflag (!%p162_p10), [#allocation3], %s186_s28 }
  0x11   : > { %383 = vperm.xlu1 (!%p162_p10), %713, %v356_v2   ;;  %373 = vperm.xlu0 (!%p162_p10), %712, %v354_v3   ;;  %v212_v23 = vld [vmem:[%s1058_s1 + $0x20] sm:$0xff] (!%p162_p10)  ;;  %v627_v24 = vld [vmem:[%s1059_s2 + $0x48] sm:$0xff] (!%p162_p10)  ;;  %v629_v28 = vld [vmem:[%s1059_s2 + $0x58] sm:$0xff] (!%p162_p10)  ;;  %s976_s30 = scalar_lea.vmem (!%p162_p10), [#allocation2], %s615_s29  ;;  %s796_s10 = smov (!%p162_p10), [#allocation2]  }
  0x12   : > { %v626_v25 = vld [vmem:[%s1059_s2 + $0x40] sm:$0xff] (!%p162_p10)  ;;  %v209_v26 = vld [vmem:[%s1058_s1 + $0x8] sm:$0xff] (!%p162_p10)  ;;  %v628_v29 = vld [vmem:[%s1059_s2 + $0x50] sm:$0xff] (!%p162_p10)  ;;  %s531_s5 = sshll.u32 (!%p162_p10), %s976_s30, 4  ;;  %s718_s11 = sshll.u32 (!%p162_p10), %s796_s10, 4  ;;  %s1003_s5 = int_to_ptr.vmem [resolvable:$true] %s531_s5  ;;  %s719_s11 = int_to_ptr.vmem [resolvable:$false] %s718_s11 }
  0x13   : > { %v213_v27 = vld [vmem:[%s1058_s1 + $0x28] sm:$0xff] (!%p162_p10)  ;;  %v210_v30 = vld [vmem:[%s1058_s1 + $0x10] sm:$0xff] (!%p162_p10)  ;;  %v630_v33 = vld [vmem:[%s1059_s2 + $0x60] sm:$0xff] (!%p162_p10)  ;;  %s720_s18 = scalar_lea.vmem (!%p162_p10), %s719_s11, 4096  ;;  %p721_p1 = scmp.lt.s32.totalorder (!%p162_p10), %s1003_s5, %s719_s11 }
  0x14   : > { %v214_v31 = vld [vmem:[%s1058_s1 + $0x30] sm:$0xff] (!%p162_p10)  ;;  %v631_v32 = vld [vmem:[%s1059_s2 + $0x68] sm:$0xff] (!%p162_p10)  ;;  %v211_v34 = vld [vmem:[%s1058_s1 + $0x18] sm:$0xff] (!%p162_p10) }
  0x15   : > { %388 = vperm.xlu1 (!%p162_p10), %713, %v357_v4   ;;  %378 = vperm.xlu0 (!%p162_p10), %712, %v355_v5   ;;  %v215_v35 = vld [vmem:[%s1058_s1 + $0x38] sm:$0xff] (!%p162_p10)  ;;  %v632_v37 = vld [vmem:[%s1059_s2 + $0x70] sm:$0xff] (!%p162_p10) }
  0x16   : > { %s191_s26 = scalar_select %p190_p11, %s784_s15, 1  ;;  %v633_v36 = vld [vmem:[%s1059_s2 + $0x78] sm:$0xff] }
  0x18   : > { %s639_s4 = sshll.u32 %s191_s26, 6 }
  0x19   : > { %s197_s9 = scalar_lea.vmem %s1057_s0, %s639_s4  ;;  %398 = vperm.xlu1 %713, %v359_v17   ;;  %393 = vperm.xlu0 %712, %v358_v18   ;;  %s640_s4 = sshll.u32 %s784_s15, 11 }
  0x1a   : > { %v201_v6 = vld [vmem:[%s197_s9 + $0x8] sm:$0xff]  ;;  %v203_v7 = vld [vmem:[%s197_s9 + $0x18] sm:$0xff]  ;;  %v200_v8 = vld [vmem:[%s197_s9] sm:$0xff]  ;;  %s1001_s7 = scalar_lea.hbm %s1060_s3, %s640_s4 }
  0x1b   : > { %v641_v9 = vpack.c.bf16 %v203_v7, %v201_v6  ;;  %v202_v10 = vld [vmem:[%s197_s9 + $0x10] sm:$0xff]  ;;  %v205_v11 = vld [vmem:[%s197_s9 + $0x28] sm:$0xff]  ;;  %v207_v12 = vld [vmem:[%s197_s9 + $0x38] sm:$0xff] }
  0x1c   : > { %v643_v13 = vpack.c.bf16 %v202_v10, %v200_v8  ;;  %v645_v14 = vpack.c.bf16 %v207_v12, %v205_v11  ;;  %v204_v15 = vld [vmem:[%s197_s9 + $0x20] sm:$0xff]  ;;  %v206_v16 = vld [vmem:[%s197_s9 + $0x30] sm:$0xff]  ;;  %s714_s9 = scalar_lea.vmem %s1003_s5, 2048 }
  0x1d   : > { %642 = vmatprep.subr.bf16.mxu0 %v641_v9  ;;  %649 = vmatprep.subr.bf16.mxu1 %v641_v9  ;;  %v647_v19 = vpack.c.bf16 %v206_v16, %v204_v15  ;;  %p715_p12 = scmp.ne.s32.totalorder %s1003_s5, %s714_s9  ;;  %p722_p2 = scmp.lt.s32.totalorder %s720_s18, %s714_s9 }
  0x1e   : > { %644 = vmatpush1.bf16.msra.mxu0 %v643_v13  ;;  %651 = vmatpush1.bf16.msra.mxu1 %v643_v13 }
  0x1f   : > { %646 = vmatprep.subr.bf16.mxu0 %v645_v14  ;;  %650 = vmatprep.subr.bf16.mxu1 %v645_v14  ;;  %p716_p13 = pnand %p715_p12, %p859_p4  ;;  %p723_p3 = por %p722_p2, %p721_p1 }
  0x20   : > { %408 = vperm.xlu1 %713, %v361_v20   ;;  %403 = vperm.xlu0 %712, %v360_v21  }
  0x21   : > { %p717_p0 = pneg %p716_p13 }
  0x22   : > { %648 = vmatpush1.bf16.msra.mxu0 %v647_v19  ;;  %652 = vmatpush1.bf16.msra.mxu1 %v647_v19 }
  0x23   : > { %p724_p5 = pnand %p723_p3, %p717_p0 }
  0x24   : > { %434 = vperm.xlu1 %713, %v627_v24   ;;  %429 = vperm.xlu0 %712, %v626_v25  }
  0x25   : > { %618 = vmatmul.mubr.msk.f32.vlgmr.msra.gmra.mrb[0].mxu0 %vm216_vm0, %v208_v22  ;;  %622 = vmatmul.mubr.msk.f32.vlgmr.msra.gmra.mrb[0].mxu1 %vm216_vm0, %v212_v23 }
  0x26   : > { %311 = vmatprep.mubr.f32.mxu0 %v794_v0  ;;  %335 = vmatprep.mubr.f32.mxu1 %v794_v0 }
  0x28   : > { %444 = vperm.xlu1 %713, %v629_v28   ;;  %439 = vperm.xlu0 %712, %v628_v29  }
  0x29   : > { %619 = vmatmul.mubr.msk.f32.gmra.mrb[2].mxu0 %vm216_vm0, %v209_v26  ;;  %623 = vmatmul.mubr.msk.f32.gmra.mrb[2].mxu1 %vm216_vm0, %v213_v27 }
  0x2a   : > { %317 = vmatprep.mubr.f32.mxu0 %v794_v0  ;;  %341 = vmatprep.mubr.f32.mxu1 %v794_v0 }
  0x2c   : > { %454 = vperm.xlu1 %713, %v631_v32   ;;  %449 = vperm.xlu0 %712, %v630_v33  }
  0x2d   : > { %620 = vmatmul.mubr.msk.f32.gmra.mrb[4].mxu0 %vm216_vm0, %v210_v30  ;;  %624 = vmatmul.mubr.msk.f32.gmra.mrb[4].mxu1 %vm216_vm0, %v214_v31 }
  0x2e   : > { %323 = vmatprep.mubr.f32.mxu0 %v794_v0  ;;  %347 = vmatprep.mubr.f32.mxu1 %v794_v0 }
  0x30   : > { %464 = vperm.xlu1 %713, %v633_v36   ;;  %459 = vperm.xlu0 %712, %v632_v37  }
  0x31   : > { %621 = vmatmul.mubr.msk.f32.gmra.mrb[6].mxu0 %vm216_vm0, %v211_v34  ;;  %625 = vmatmul.mubr.msk.f32.gmra.mrb[6].mxu1 %vm216_vm0, %v215_v35 }
  0x90   : > { %v374_v38 = vpop.permute.xlu0 %373  ;;  %v384_v39 = vpop.permute.xlu1 %383 }
  0x94   : > { %v379_v40 = vpop.permute.xlu0 %378  ;;  %v967_v41 = vpop.permute.xlu1 %388 }
  0x98   : > { %v394_v42 = vpop.permute.xlu0 %393  ;;  %v399_v43 = vpop.permute.xlu1 %398 }
  0x9f   : > { %v404_v44 = vpop.permute.xlu0 %403  ;;  %v969_v45 = vpop.permute.xlu1 %408 }
  0xa3   : > { %v430_v46 = vpop.permute.xlu0 %429  ;;  %v435_v47 = vpop.permute.xlu1 %434 }
  0xa7   : > { %v440_v48 = vpop.permute.xlu0 %439  ;;  %v972_v49 = vpop.permute.xlu1 %444 }
  0xab   : > { %v450_v56 = vpop.permute.xlu0 %449  ;;  %v455_v7 = vpop.permute.xlu1 %454 }
  0xaf   : > { %v460_v24 = vpop.permute.xlu0 %459 }
  0xf8   : > { %v307_v50 = vpop.f32.mrb[0].mxu0  ;;  %v331_v51 = vpop.f32.mrb[0].mxu1 }
  0xf9   : > { %v411_v52 = vmul.f32 %v374_v38, %v307_v50  ;;  %v419_v53 = vmul.f32 %v394_v42, %v331_v51  ;;  %v309_v54 = vpop.f32.mrb[1].mxu0  ;;  %v333_v55 = vpop.f32.mrb[1].mxu1 }
  0xfa   : > { %v412_v57 = vmul.f32 %v374_v38, %v309_v54  ;;  %v420_v58 = vmul.f32 %v394_v42, %v333_v55  ;;  %v465_v42 = vpop.permute.xlu1 %464 }
  0xfb   : > { %v467_v59 = vadd.f32 %v430_v46, %v411_v52  ;;  %v475_v60 = vadd.f32 %v450_v56, %v419_v53 }
  0xfc   : > { %v468_v61 = vadd.f32 %v430_v46, %v412_v57  ;;  %v476_v62 = vadd.f32 %v450_v56, %v420_v58  ;;  %v313_v63 = vpop.f32.mrb[2].mxu0  ;;  %v337_v0 = vpop.f32.mrb[2].mxu1 }
  0xfd   : > { %v483_v1 = vmax.f32 %v467_v59, 0.0  ;;  %v491_v2 = vmax.f32 %v475_v60, 0.0  ;;  %v413_v3 = vmul.f32 %v379_v40, %v313_v63  ;;  %v421_v4 = vmul.f32 %v399_v43, %v337_v0  ;;  %v315_v5 = vpop.f32.mrb[3].mxu0  ;;  %v339_v6 = vpop.f32.mrb[3].mxu1 }
  0xfe   : > { %v484_v8 = vmax.f32 %v468_v61, 0.0  ;;  %v492_v9 = vmax.f32 %v476_v62, 0.0  ;;  %v414_v10 = vmul.f32 %v379_v40, %v315_v5  ;;  %v422_v11 = vmul.f32 %v399_v43, %v339_v6 }
  0xff   : > { %499 = vst [vmem:[%s976_s30] sm:$0xff] %v483_v1  ;;  %507 = vst [vmem:[%s976_s30 + $0x40] sm:$0xff] %v491_v2  ;;  %v469_v12 = vadd.f32 %v435_v47, %v413_v3  ;;  %v477_v13 = vadd.f32 %v455_v7, %v421_v4 }
 0x100   : > { %500 = vst [vmem:[%s976_s30 + $0x8] sm:$0xff] %v484_v8  ;;  %508 = vst [vmem:[%s976_s30 + $0x48] sm:$0xff] %v492_v9  ;;  %v470_v14 = vadd.f32 %v435_v47, %v414_v10  ;;  %v478_v15 = vadd.f32 %v455_v7, %v422_v11  ;;  %v319_v16 = vpop.f32.mrb[4].mxu0  ;;  %v343_v17 = vpop.f32.mrb[4].mxu1 }
 0x101   : > { %v485_v18 = vmax.f32 %v469_v12, 0.0  ;;  %v493_v19 = vmax.f32 %v477_v13, 0.0  ;;  %v415_v20 = vmul.f32 %v384_v39, %v319_v16  ;;  %v423_v21 = vmul.f32 %v404_v44, %v343_v17  ;;  %v321_v22 = vpop.f32.mrb[5].mxu0  ;;  %v345_v23 = vpop.f32.mrb[5].mxu1 }
 0x102   : > { %v486_v25 = vmax.f32 %v470_v14, 0.0  ;;  %v494_v26 = vmax.f32 %v478_v15, 0.0  ;;  %v416_v27 = vmul.f32 %v384_v39, %v321_v22  ;;  %v424_v28 = vmul.f32 %v404_v44, %v345_v23 }
 0x103   : > { %501 = vst [vmem:[%s976_s30 + $0x10] sm:$0xff] %v485_v18  ;;  %509 = vst [vmem:[%s976_s30 + $0x50] sm:$0xff] %v493_v19  ;;  %v471_v29 = vadd.f32 %v440_v48, %v415_v20  ;;  %v479_v30 = vadd.f32 %v460_v24, %v423_v21 }
 0x104   : > { %502 = vst [vmem:[%s976_s30 + $0x18] sm:$0xff] %v486_v25  ;;  %510 = vst [vmem:[%s976_s30 + $0x58] sm:$0xff] %v494_v26  ;;  %v472_v31 = vadd.f32 %v440_v48, %v416_v27  ;;  %v480_v32 = vadd.f32 %v460_v24, %v424_v28  ;;  %v325_v33 = vpop.f32.mrb[6].mxu0  ;;  %v349_v34 = vpop.f32.mrb[6].mxu1 }
 0x105   : > { %v487_v35 = vmax.f32 %v471_v29, 0.0  ;;  %v495_v36 = vmax.f32 %v479_v30, 0.0  ;;  %v417_v37 = vmul.f32 %v967_v41, %v325_v33  ;;  %v425_v38 = vmul.f32 %v969_v45, %v349_v34  ;;  %v327_v39 = vpop.f32.mrb[7].mxu0  ;;  %v351_v40 = vpop.f32.mrb[7].mxu1 }
 0x106   : > { %v488_v43 = vmax.f32 %v472_v31, 0.0  ;;  %v496_v44 = vmax.f32 %v480_v32, 0.0  ;;  %v418_v46 = vmul.f32 %v967_v41, %v327_v39  ;;  %v426_v47 = vmul.f32 %v969_v45, %v351_v40 }
 0x107   : > { %503 = vst [vmem:[%s976_s30 + $0x20] sm:$0xff] %v487_v35  ;;  %511 = vst [vmem:[%s976_s30 + $0x60] sm:$0xff] %v495_v36  ;;  %v473_v48 = vadd.f32 %v972_v49, %v417_v37  ;;  %v481_v50 = vadd.f32 %v465_v42, %v425_v38 }
 0x108   : > { %504 = vst [vmem:[%s976_s30 + $0x28] sm:$0xff] %v488_v43  ;;  %512 = vst [vmem:[%s976_s30 + $0x68] sm:$0xff] %v496_v44  ;;  %v474_v51 = vadd.f32 %v972_v49, %v418_v46  ;;  %v482_v41 = vadd.f32 %v465_v42, %v426_v47 }
 0x109   : > { %v489_v52 = vmax.f32 %v473_v48, 0.0  ;;  %v497_v45 = vmax.f32 %v481_v50, 0.0 }
 0x10a   : > { %v490_v53 = vmax.f32 %v474_v51, 0.0  ;;  %v498_v54 = vmax.f32 %v482_v41, 0.0 }
 0x10b   : > { %505 = vst [vmem:[%s976_s30 + $0x30] sm:$0xff] %v489_v52  ;;  %513 = vst [vmem:[%s976_s30 + $0x70] sm:$0xff] %v497_v45 }
 0x10c   : > { %506 = vst [vmem:[%s976_s30 + $0x38] sm:$0xff] %v490_v53  ;;  %514 = vst [vmem:[%s976_s30 + $0x78] sm:$0xff] %v498_v54 }
 0x10d   : > { %727 = shalt.err (!%p724_p5)
}
 0x10e   : > { %s728_s19 = scalar_lea.hbm %s1001_s7, 2048  ;;  %s732_s26 = scalar_lea.hbm %s1060_s3, 4096 }
 0x10f   : > { %p729_p6 = scmp.ne.s32.totalorder %s1001_s7, %s728_s19  ;;  %p733_p10 = scmp.lt.u32.totalorder %s1001_s7, %s1060_s3 }
 0x110   : > { %p734_p11 = scmp.lt.u32.totalorder %s732_s26, %s728_s19  ;;  %p736_p13 = scmp.lt.u32.totalorder %s728_s19, %s1001_s7 }
 0x111   : > { %p730_p7 = pnand %p729_p6, %p859_p4 }
 0x112   : > { %p735_p12 = por %p734_p11, %p733_p10 }
 0x113   : > { %p731_p9 = pneg %p730_p7 }
 0x114   : > { %p737_p0 = por %p736_p13, %p735_p12 }
 0x116   : > { %p738_p1 = pnand %p737_p0, %p731_p9 }
 0x118   : > { %741 = shalt.err (!%p738_p1)
}
 0x119   : > { %s797_s29 = smov 256   ;;  %s798_s30 = smov 16  }
 0x11a   : > { %653 = dma.vmem_to_hbm [thread:$0]  (%p859_p4), %s1003_s5, 2048, %s1001_s7, %s1011_s8, %s797_s29, %s797_s29, %s798_s30  }
 0x11b PF: > { %p659_p2 = scmp.ge.s32.totalorder %s792_s17, 2  ;;  %s546_s4 = sand.u32 1, %s772_s12  }
 0x11c   : > { %s547_s15 = scalar_lea.sflag [#allocation3], %s546_s4 }
 0x11d   : > { %p656_p3 = pnand %p659_p2, %p866_p8 }
 0x11f   : > { %767 = dma.done.wait (!%p656_p3), %s547_s15, 2048  }
 0x120   : > { %769 = vsyncadd (!%p656_p3), %s547_s15, 4294965248  ;;  %s16_s17 = sadd.s32 1, %s792_s17   ;;  %s1063_s12 = smov %s776_s13 }
 0x121   : > { %p13_p5 = scmp.ge.s32.totalorder %s16_s17, 4   ;;  %s1064_s13 = smov %s780_s14 }
 0x122   : > { %s1065_s14 = smov %s872_s25  ;;  %s1066_s15 = smov %s788_s16 }
 0x123   : > { %s1067_s16 = smov %s1069_s20  ;;  %15 = sbr.rel (!%p13_p5) target bundleno = 4 (0x4), region = 68 }
 0x12a   :  { %552 = vsyncpa [#allocation3], 1 }
 0x12b   :  { %554 = vsyncpa [#allocation3 + $0x1], 1 }

</bundles_post_ra>
